<compile_context>
chip_gen: v7x
topology: tpu7x:2x2x1
jax: 0.10.0
libtpu: 0.0.40
codegen_flags: <defaults>
</compile_context>

<pallas_src>
import jax
import jax.numpy as jnp
from jax.experimental import pallas as pl
from jax.experimental.pallas import tpu as pltpu


def _round_up(x, m):
    return ((x + m - 1) // m) * m


def _make_kernel(H, HP, LP):
    """Kernel closure over static sizes. One grid step == one decoder step."""

    def kernel(emb_ref, h0_ref, enc_ref,
               w_emb_ref, w_hid_ref, b_attn_ref,
               w_comb_att_ref, b_comb_ref,
               w_ih_ref, b_ih_ref, b_hh_ref,
               w_out_ref, b_out_ref,
               logp_ref, hid_ref, attn_ref,
               hid_scr):
        t = pl.program_id(0)

        @pl.when(t == 0)
        def _():
            hid_scr[...] = h0_ref[...]

        hid = hid_scr[...]                                   # [1, H] f32

        # embedding row (gathered in wrapper); dropout(embedded) == identity (eval)
        emb = emb_ref[pl.ds(t, 1), :]                        # [1, H] f32
        emb_bf = emb.astype(jnp.bfloat16)
        hid_bf = hid.astype(jnp.bfloat16)

        # fused projections:
        #   emb -> [attn_logits | combine-half], hid -> [attn_logits | W_hh r/z/n]
        emb_proj = jnp.dot(emb_bf, w_emb_ref[...],
                           preferred_element_type=jnp.float32)        # [1, LP+H]
        hid_proj = jnp.dot(hid_bf, w_hid_ref[...],
                           preferred_element_type=jnp.float32)        # [1, LP+3HP]

        # attn_weights = softmax(attn(cat(embedded, hidden)))  (pad lanes -> -1e30)
        attn_logits = emb_proj[:, :LP] + hid_proj[:, :LP] + b_attn_ref[...]
        m = jnp.max(attn_logits, axis=-1, keepdims=True)
        e = jnp.exp(attn_logits - m)
        attn_w = e / jnp.sum(e, axis=-1, keepdims=True)                # [1, LP]
        attn_ref[pl.ds(t, 1), :] = attn_w                    # resident block, row t

        # attn_applied = attn_weights @ encoder_outputs  (pad rows are zero)
        attn_applied = jnp.dot(attn_w.astype(jnp.bfloat16), enc_ref[...],
                               preferred_element_type=jnp.float32)    # [1, H]

        # output = relu(attn_combine(cat(embedded, attn_applied)))   (n_layers=1)
        combined = (emb_proj[:, LP:LP + H]
                    + jnp.dot(attn_applied.astype(jnp.bfloat16), w_comb_att_ref[...],
                              preferred_element_type=jnp.float32)
                    + b_comb_ref[...])                                # [1, H]
        x = jnp.maximum(combined, 0.0)

        # single-step GRU; gate columns live at lane-aligned HP offsets (r, z, n)
        i_rzn = jnp.dot(x.astype(jnp.bfloat16), w_ih_ref[...],
                        preferred_element_type=jnp.float32) + b_ih_ref[...]   # [1, 3HP]
        h_rzn = hid_proj[:, LP:] + b_hh_ref[...]                              # [1, 3HP]
        r = jax.nn.sigmoid(i_rzn[:, 0 * HP:0 * HP + H] + h_rzn[:, 0 * HP:0 * HP + H])
        z = jax.nn.sigmoid(i_rzn[:, 1 * HP:1 * HP + H] + h_rzn[:, 1 * HP:1 * HP + H])
        n = jnp.tanh(i_rzn[:, 2 * HP:2 * HP + H]
                     + r * h_rzn[:, 2 * HP:2 * HP + H])
        h_new = (1.0 - z) * n + z * hid                               # [1, H]
        hid_scr[...] = h_new
        hid_ref[pl.ds(t, 1), :] = h_new                     # resident block, row t

        # output = log_softmax(out(gru_output))  (pad lanes -> -1e30, sliced off)
        logits = jnp.dot(h_new.astype(jnp.bfloat16), w_out_ref[...],
                         preferred_element_type=jnp.float32) + b_out_ref[...]  # [1, VP]
        mo = jnp.max(logits, axis=-1, keepdims=True)
        sh = logits - mo
        logp_ref[pl.ds(t, 1), :] = sh - jnp.log(
            jnp.sum(jnp.exp(sh), axis=-1, keepdims=True))

    return kernel


def pack_params(p, L, LP, HP, VP):
    """Fused / lane-padded kernel weights (matmul operands in bf16, biases f32)."""
    H = p["W_comb"].shape[-1]
    V = p["W_out"].shape[-1]
    f = jnp.float32
    bf = jnp.bfloat16

    # emb -> [attn half (L, padded to LP) | combine half (H)]
    w_emb = jnp.zeros((H, LP + H), f)
    w_emb = w_emb.at[:, :L].set(p["W_attn"][0]).at[:, LP:].set(p["W_comb"][0])

    # hid -> [attn half (LP) | W_hh r | W_hh z | W_hh n]  (gates at HP offsets)
    w_hid = jnp.zeros((H, LP + 3 * HP), f)
    w_hid = w_hid.at[:, :L].set(p["W_attn"][1])
    w_ih = jnp.zeros((H, 3 * HP), f)
    b_ih = jnp.zeros((1, 3 * HP), f)
    b_hh = jnp.zeros((1, 3 * HP), f)
    for g in range(3):
        w_hid = w_hid.at[:, LP + g * HP:LP + g * HP + H].set(p["W_hh"][g])
        w_ih = w_ih.at[:, g * HP:g * HP + H].set(p["W_ih"][g])
        b_ih = b_ih.at[:, g * HP:g * HP + H].set(p["b_ih"][g])
        b_hh = b_hh.at[:, g * HP:g * HP + H].set(p["b_hh"][g])

    # pad sentinels stay f32 (-1e30 would not survive fp8/int quantization)
    b_attn = jnp.full((1, LP), -1e30, f).at[:, :L].set(p["b_attn"])
    w_out = jnp.zeros((H, VP), f).at[:, :V].set(p["W_out"])
    b_out = jnp.full((1, VP), -1e30, f).at[:, :V].set(p["b_out"])

    return dict(w_emb=w_emb.astype(bf), w_hid=w_hid.astype(bf), b_attn=b_attn,
                w_comb_att=p["W_comb"][1].astype(bf), b_comb=p["b_comb"],
                w_ih=w_ih.astype(bf), b_ih=b_ih, b_hh=b_hh,
                w_out=w_out.astype(bf), b_out=b_out)


def attn_decoder_decode(tokens, hidden0, encoder_outputs, p):
    """Run T decoder steps inside one kernel.

    tokens: [T] int32, hidden0: [1,1,H], encoder_outputs: [L,H].
    Returns (log_probs [T,V], hiddens [T,H], attn_weights [T,L])."""
    H = hidden0.shape[-1]
    L = encoder_outputs.shape[0]
    V = p["W_out"].shape[-1]
    T = tokens.shape[0]
    LP = _round_up(L, 128)
    VP = _round_up(V, 128)
    HP = _round_up(H, 128)

    pk = pack_params(p, L, LP, HP, VP)
    # Embedding gather happens in the wrapper (no one-hot matmul in the kernel).
    emb_seq = p["embedding"][tokens.astype(jnp.int32)].astype(jnp.float32)  # [T, H]
    enc_pad = jnp.zeros((LP, H), jnp.float32).at[:L].set(
        encoder_outputs.astype(jnp.float32)).astype(jnp.bfloat16)
    h0 = hidden0.reshape(1, H).astype(jnp.float32)

    inputs = (emb_seq, h0, enc_pad,
              pk["w_emb"], pk["w_hid"], pk["b_attn"],
              pk["w_comb_att"], pk["b_comb"],
              pk["w_ih"], pk["b_ih"], pk["b_hh"],
              pk["w_out"], pk["b_out"])

    out_shapes = (jax.ShapeDtypeStruct((T, VP), jnp.float32),
                  jax.ShapeDtypeStruct((T, H), jnp.float32),
                  jax.ShapeDtypeStruct((T, LP), jnp.float32))

    def resident_spec(shape, single_buffer):
        # whole-array block + constant index_map -> DMA'd once, stays VMEM-resident
        zeros = (0,) * len(shape)
        idx = lambda t, _z=zeros: _z
        if single_buffer:
            # constant block index -> double buffering is pure waste (v7x: 64 MiB)
            return pl.BlockSpec(shape, idx, pipeline_mode=pl.Buffered(1))
        return pl.BlockSpec(shape, idx)

    in_bytes = int(sum(x.size * x.dtype.itemsize for x in inputs))
    out_bytes = int(4 * T * (VP + H + LP))
    scratch_bytes = 4 * H
    vmem_limit = int(min(max(2 * (in_bytes + out_bytes + scratch_bytes) + (4 << 20),
                             16 << 20), 64 << 20))

    flops = int(2 * T * (H * (LP + H) + H * (LP + 3 * HP) + LP * H
                         + H * H + H * 3 * HP + H * VP))
    transc = int(T * (LP + 3 * H + VP))
    cost = pl.CostEstimate(flops=flops, transcendentals=transc,
                           bytes_accessed=in_bytes + out_bytes)

    def build(single_buffer):
        grid_spec = pltpu.PrefetchScalarGridSpec(
            num_scalar_prefetch=0,
            grid=(T,),
            in_specs=[resident_spec(x.shape, single_buffer) for x in inputs],
            out_specs=(
                # resident output accumulators: written row-by-row, flushed once
                resident_spec((T, VP), False),
                resident_spec((T, H), False),
                resident_spec((T, LP), False),
            ),
            scratch_shapes=[pltpu.VMEM((1, H), jnp.float32)],   # carried hidden
        )
        return pl.pallas_call(
            _make_kernel(H, HP, LP),
            out_shape=out_shapes,
            grid_spec=grid_spec,
            cost_estimate=cost,
            compiler_params=pltpu.CompilerParams(
                dimension_semantics=("arbitrary",),   # sequential: hidden carry
                vmem_limit_bytes=vmem_limit),
        )

    try:
        logp, hid, attn = build(single_buffer=True)(*inputs)
    except Exception:
        # Fallback if this jax build rejects pl.Buffered(1) on constant blocks.
        logp, hid, attn = build(single_buffer=False)(*inputs)

    return logp[:, :V], hid, attn[:, :L]


def init_params(key, H, V, L):
    ks = jax.random.split(key, 11)
    s = 0.1
    f = jnp.float32
    return {
        "embedding": jax.random.normal(ks[0], (V, H), f) * s,
        "W_attn":    jax.random.normal(ks[1], (2, H, L), f) * s,   # [emb half, hid half]
        "b_attn":    jax.random.normal(ks[2], (1, L), f) * s,
        "W_comb":    jax.random.normal(ks[3], (2, H, H), f) * s,   # [emb half, attn half]
        "b_comb":    jax.random.normal(ks[4], (1, H), f) * s,
        "W_ih":      jax.random.normal(ks[5], (3, H, H), f) * s,   # gate order r, z, n
        "b_ih":      jax.random.normal(ks[6], (3, 1, H), f) * s,
        "W_hh":      jax.random.normal(ks[7], (3, H, H), f) * s,
        "b_hh":      jax.random.normal(ks[8], (3, 1, H), f) * s,
        "W_out":     jax.random.normal(ks[9], (H, V), f) * s,
        "b_out":     jax.random.normal(ks[10], (1, V), f) * s,
    }


def reference_forward(token_id, hidden, encoder_outputs, p):
    """Pure-JAX single-step reference mirroring the PyTorch forward semantics."""
    H = hidden.shape[-1]
    emb = p["embedding"][token_id][None, :]
    hid = hidden.reshape(1, H)
    attn_logits = emb @ p["W_attn"][0] + hid @ p["W_attn"][1] + p["b_attn"]
    attn_w = jax.nn.softmax(attn_logits, axis=-1)
    attn_applied = attn_w @ encoder_outputs
    combined = emb @ p["W_comb"][0] + attn_applied @ p["W_comb"][1] + p["b_comb"]
    x = jax.nn.relu(combined)
    i_r = x @ p["W_ih"][0] + p["b_ih"][0]
    i_z = x @ p["W_ih"][1] + p["b_ih"][1]
    i_n = x @ p["W_ih"][2] + p["b_ih"][2]
    h_r = hid @ p["W_hh"][0] + p["b_hh"][0]
    h_z = hid @ p["W_hh"][1] + p["b_hh"][1]
    h_n = hid @ p["W_hh"][2] + p["b_hh"][2]
    r = jax.nn.sigmoid(i_r + h_r)
    z = jax.nn.sigmoid(i_z + h_z)
    n = jnp.tanh(i_n + r * h_n)
    h_new = (1.0 - z) * n + z * hid
    logits = h_new @ p["W_out"] + p["b_out"]
    logp = jax.nn.log_softmax(logits, axis=-1)
    return logp, h_new.reshape(1, 1, H), attn_w


if __name__ == "__main__":
    H = 32      # hidden_size (small demo value)
    V = 48      # output_size (vocab)
    L = 16      # max_length
    T = 8       # decode steps run inside one kernel

    key = jax.random.PRNGKey(0)
    kp, kh, ke, kt = jax.random.split(key, 4)
    params = init_params(kp, H, V, L)

    tokens = jax.random.randint(kt, (T,), 0, V, dtype=jnp.int32)
    hidden0 = jax.random.normal(kh, (1, 1, H), jnp.float32)
    encoder_outputs = jax.random.normal(ke, (L, H), jnp.float32)

    logp_all, hid_all, attn_all = attn_decoder_decode(tokens, hidden0,
                                                      encoder_outputs, params)
    jax.block_until_ready((logp_all, hid_all, attn_all))

    # step-by-step pure-JAX f32 reference (same semantics as the PyTorch module).
    # Tolerance accounts for bf16 MXU operands inside the kernel (the reference
    # is computed entirely in f32); observed deviations are ~1e-3, bound 2e-2.
    tol = dict(atol=2e-2, rtol=2e-2)
    hid = hidden0
    for t in range(T):
        ref_logp, hid, ref_attn = reference_forward(tokens[t], hid,
                                                    encoder_outputs, params)
        assert jnp.allclose(logp_all[t], ref_logp[0], **tol), f"logp mismatch @ step {t}"
        assert jnp.allclose(hid_all[t], hid.reshape(-1), **tol), f"hidden mismatch @ step {t}"
        assert jnp.allclose(attn_all[t], ref_attn[0], **tol), f"attn mismatch @ step {t}"

    print("KERNEL_OK")
</pallas_src>

<mosaic_0001>
module attributes {stable_mosaic.version = 11 : i64} {
  func.func @kernel(%arg0: i32, %arg1: memref<8x32xf32, #tpu.memory_space<vmem>>, %arg2: memref<1x32xf32, #tpu.memory_space<vmem>>, %arg3: memref<128x32xbf16, #tpu.memory_space<vmem>>, %arg4: memref<32x160xbf16, #tpu.memory_space<vmem>>, %arg5: memref<32x512xbf16, #tpu.memory_space<vmem>>, %arg6: memref<1x128xf32, #tpu.memory_space<vmem>>, %arg7: memref<32x32xbf16, #tpu.memory_space<vmem>>, %arg8: memref<1x32xf32, #tpu.memory_space<vmem>>, %arg9: memref<32x384xbf16, #tpu.memory_space<vmem>>, %arg10: memref<1x384xf32, #tpu.memory_space<vmem>>, %arg11: memref<1x384xf32, #tpu.memory_space<vmem>>, %arg12: memref<32x128xbf16, #tpu.memory_space<vmem>>, %arg13: memref<1x128xf32, #tpu.memory_space<vmem>>, %arg14: memref<8x128xf32, #tpu.memory_space<vmem>>, %arg15: memref<8x32xf32, #tpu.memory_space<vmem>>, %arg16: memref<8x128xf32, #tpu.memory_space<vmem>>, %arg17: memref<1x32xf32, #tpu.memory_space<vmem>>) attributes {dimension_semantics = [#tpu.dimension_semantics<arbitrary>], iteration_bounds = array<i64: 8>, scalar_prefetch = 0 : i64, scratch_operands = 1 : i64, tpu.core_type = #tpu.core_type<tc>, window_params = [{pipeline_mode = #tpu.pipeline_mode<synchronous>, transform_indices = @transform_0, window_bounds = array<i64: 8, 32>}, {pipeline_mode = #tpu.pipeline_mode<synchronous>, transform_indices = @transform_1, window_bounds = array<i64: 1, 32>}, {pipeline_mode = #tpu.pipeline_mode<synchronous>, transform_indices = @transform_2, window_bounds = array<i64: 128, 32>}, {pipeline_mode = #tpu.pipeline_mode<synchronous>, transform_indices = @transform_3, window_bounds = array<i64: 32, 160>}, {pipeline_mode = #tpu.pipeline_mode<synchronous>, transform_indices = @transform_4, window_bounds = array<i64: 32, 512>}, {pipeline_mode = #tpu.pipeline_mode<synchronous>, transform_indices = @transform_5, window_bounds = array<i64: 1, 128>}, {pipeline_mode = #tpu.pipeline_mode<synchronous>, transform_indices = @transform_6, window_bounds = array<i64: 32, 32>}, {pipeline_mode = #tpu.pipeline_mode<synchronous>, transform_indices = @transform_7, window_bounds = array<i64: 1, 32>}, {pipeline_mode = #tpu.pipeline_mode<synchronous>, transform_indices = @transform_8, window_bounds = array<i64: 32, 384>}, {pipeline_mode = #tpu.pipeline_mode<synchronous>, transform_indices = @transform_9, window_bounds = array<i64: 1, 384>}, {pipeline_mode = #tpu.pipeline_mode<synchronous>, transform_indices = @transform_10, window_bounds = array<i64: 1, 384>}, {pipeline_mode = #tpu.pipeline_mode<synchronous>, transform_indices = @transform_11, window_bounds = array<i64: 32, 128>}, {pipeline_mode = #tpu.pipeline_mode<synchronous>, transform_indices = @transform_12, window_bounds = array<i64: 1, 128>}, {pipeline_mode = #tpu.pipeline_mode<synchronous>, transform_indices = @transform_13, window_bounds = array<i64: 8, 128>}, {pipeline_mode = #tpu.pipeline_mode<synchronous>, transform_indices = @transform_14, window_bounds = array<i64: 8, 32>}, {pipeline_mode = #tpu.pipeline_mode<synchronous>, transform_indices = @transform_15, window_bounds = array<i64: 8, 128>}]} {
    %c0_i32 = arith.constant 0 : i32
    %0 = arith.cmpi eq, %arg0, %c0_i32 : i32
    %1 = arith.extui %0 : i1 to i32
    %c0_i32_0 = arith.constant 0 : i32
    %2 = arith.cmpi ne, %1, %c0_i32_0 : i32
    scf.if %2 {
      %c0_43 = arith.constant 0 : index
      %c0_44 = arith.constant 0 : index
      %94 = vector.load %arg2[%c0_43, %c0_44] : memref<1x32xf32, #tpu.memory_space<vmem>>, vector<1x32xf32>
      %c0_45 = arith.constant 0 : index
      %c0_46 = arith.constant 0 : index
      %95 = vector.load %arg17[%c0_45, %c0_46] : memref<1x32xf32, #tpu.memory_space<vmem>>, vector<1x32xf32>
      tpu.vector_store %arg17[%c0_45, %c0_46], %94 {strides = array<i32>} : memref<1x32xf32, #tpu.memory_space<vmem>>, vector<1x32xf32>,
    } else {
    }
    %c0 = arith.constant 0 : index
    %c0_1 = arith.constant 0 : index
    %3 = vector.load %arg17[%c0, %c0_1] : memref<1x32xf32, #tpu.memory_space<vmem>>, vector<1x32xf32>
    %4 = arith.index_cast %arg0 : i32 to index
    %c0_2 = arith.constant 0 : index
    %5 = vector.load %arg1[%4, %c0_2] : memref<8x32xf32, #tpu.memory_space<vmem>>, vector<1x32xf32>
    %6 = arith.truncf %5 : vector<1x32xf32> to vector<1x32xbf16>
    %7 = arith.truncf %3 : vector<1x32xf32> to vector<1x32xbf16>
    %c0_3 = arith.constant 0 : index
    %c0_4 = arith.constant 0 : index
    %8 = vector.load %arg4[%c0_3, %c0_4] : memref<32x160xbf16, #tpu.memory_space<vmem>>, vector<32x160xbf16>
    %cst = arith.constant dense<0.000000e+00> : vector<1x160xf32>
    %9 = tpu.matmul %6, %8, %cst {dimension_numbers = #tpu.dot_dimension_numbers<[1], [0], [0], [1], [0, 0, 1, 1], [], []>} : vector<1x32xbf16>, vector<32x160xbf16>, vector<1x160xf32> -> vector<1x160xf32>
    %c0_5 = arith.constant 0 : index
    %c0_6 = arith.constant 0 : index
    %10 = vector.load %arg5[%c0_5, %c0_6] : memref<32x512xbf16, #tpu.memory_space<vmem>>, vector<32x512xbf16>
    %cst_7 = arith.constant dense<0.000000e+00> : vector<1x512xf32>
    %11 = tpu.matmul %7, %10, %cst_7 {dimension_numbers = #tpu.dot_dimension_numbers<[1], [0], [0], [1], [0, 0, 1, 1], [], []>} : vector<1x32xbf16>, vector<32x512xbf16>, vector<1x512xf32> -> vector<1x512xf32>
    %12 = vector.extract_strided_slice %9 {offsets = [0, 0], sizes = [1, 128], strides = [1, 1]} : vector<1x160xf32> to vector<1x128xf32>
    %13 = vector.extract_strided_slice %11 {offsets = [0, 0], sizes = [1, 128], strides = [1, 1]} : vector<1x512xf32> to vector<1x128xf32>
    %14 = arith.addf %12, %13 : vector<1x128xf32>
    %c0_8 = arith.constant 0 : index
    %c0_9 = arith.constant 0 : index
    %15 = vector.load %arg6[%c0_8, %c0_9] : memref<1x128xf32, #tpu.memory_space<vmem>>, vector<1x128xf32>
    %16 = arith.addf %14, %15 : vector<1x128xf32>
    %cst_10 = arith.constant dense<0xFF800000> : vector<1xf32>
    %17 = vector.multi_reduction <maximumf>, %16, %cst_10 [1] : vector<1x128xf32> to vector<1xf32>
    %18 = vector.shape_cast %17 : vector<1xf32> to vector<1x1xf32>
    %19 = vector.broadcast %18 : vector<1x1xf32> to vector<1x128xf32>
    %20 = arith.subf %16, %19 : vector<1x128xf32>
    %21 = math.exp %20 : vector<1x128xf32>
    %cst_11 = arith.constant dense<0.000000e+00> : vector<1xf32>
    %22 = vector.multi_reduction <add>, %21, %cst_11 [1] : vector<1x128xf32> to vector<1xf32>
    %23 = vector.shape_cast %22 : vector<1xf32> to vector<1x1xf32>
    %24 = vector.broadcast %23 : vector<1x1xf32> to vector<1x128xf32>
    %25 = arith.divf %21, %24 : vector<1x128xf32>
    %26 = arith.index_cast %arg0 : i32 to index
    %c0_12 = arith.constant 0 : index
    %27 = vector.load %arg16[%26, %c0_12] : memref<8x128xf32, #tpu.memory_space<vmem>>, vector<1x128xf32>
    tpu.vector_store %arg16[%26, %c0_12], %25 {strides = array<i32>} : memref<8x128xf32, #tpu.memory_space<vmem>>, vector<1x128xf32>,
    %28 = arith.truncf %25 : vector<1x128xf32> to vector<1x128xbf16>
    %c0_13 = arith.constant 0 : index
    %c0_14 = arith.constant 0 : index
    %29 = vector.load %arg3[%c0_13, %c0_14] : memref<128x32xbf16, #tpu.memory_space<vmem>>, vector<128x32xbf16>
    %cst_15 = arith.constant dense<0.000000e+00> : vector<1x32xf32>
    %30 = tpu.matmul %28, %29, %cst_15 {dimension_numbers = #tpu.dot_dimension_numbers<[1], [0], [0], [1], [0, 0, 1, 1], [], []>} : vector<1x128xbf16>, vector<128x32xbf16>, vector<1x32xf32> -> vector<1x32xf32>
    %31 = vector.extract_strided_slice %9 {offsets = [0, 128], sizes = [1, 32], strides = [1, 1]} : vector<1x160xf32> to vector<1x32xf32>
    %32 = arith.truncf %30 : vector<1x32xf32> to vector<1x32xbf16>
    %c0_16 = arith.constant 0 : index
    %c0_17 = arith.constant 0 : index
    %33 = vector.load %arg7[%c0_16, %c0_17] : memref<32x32xbf16, #tpu.memory_space<vmem>>, vector<32x32xbf16>
    %cst_18 = arith.constant dense<0.000000e+00> : vector<1x32xf32>
    %34 = tpu.matmul %32, %33, %cst_18 {dimension_numbers = #tpu.dot_dimension_numbers<[1], [0], [0], [1], [0, 0, 1, 1], [], []>} : vector<1x32xbf16>, vector<32x32xbf16>, vector<1x32xf32> -> vector<1x32xf32>
    %35 = arith.addf %31, %34 : vector<1x32xf32>
    %c0_19 = arith.constant 0 : index
    %c0_20 = arith.constant 0 : index
    %36 = vector.load %arg8[%c0_19, %c0_20] : memref<1x32xf32, #tpu.memory_space<vmem>>, vector<1x32xf32>
    %37 = arith.addf %35, %36 : vector<1x32xf32>
    %cst_21 = arith.constant 0.000000e+00 : f32
    %38 = vector.broadcast %cst_21 : f32 to vector<1x32xf32>
    %39 = arith.maximumf %37, %38 : vector<1x32xf32>
    %40 = arith.truncf %39 : vector<1x32xf32> to vector<1x32xbf16>
    %c0_22 = arith.constant 0 : index
    %c0_23 = arith.constant 0 : index
    %41 = vector.load %arg9[%c0_22, %c0_23] : memref<32x384xbf16, #tpu.memory_space<vmem>>, vector<32x384xbf16>
    %cst_24 = arith.constant dense<0.000000e+00> : vector<1x384xf32>
    %42 = tpu.matmul %40, %41, %cst_24 {dimension_numbers = #tpu.dot_dimension_numbers<[1], [0], [0], [1], [0, 0, 1, 1], [], []>} : vector<1x32xbf16>, vector<32x384xbf16>, vector<1x384xf32> -> vector<1x384xf32>
    %c0_25 = arith.constant 0 : index
    %c0_26 = arith.constant 0 : index
    %43 = vector.load %arg10[%c0_25, %c0_26] : memref<1x384xf32, #tpu.memory_space<vmem>>, vector<1x384xf32>
    %44 = arith.addf %42, %43 : vector<1x384xf32>
    %45 = vector.extract_strided_slice %11 {offsets = [0, 128], sizes = [1, 384], strides = [1, 1]} : vector<1x512xf32> to vector<1x384xf32>
    %c0_27 = arith.constant 0 : index
    %c0_28 = arith.constant 0 : index
    %46 = vector.load %arg11[%c0_27, %c0_28] : memref<1x384xf32, #tpu.memory_space<vmem>>, vector<1x384xf32>
    %47 = arith.addf %45, %46 : vector<1x384xf32>
    %48 = vector.extract_strided_slice %44 {offsets = [0, 0], sizes = [1, 32], strides = [1, 1]} : vector<1x384xf32> to vector<1x32xf32>
    %49 = vector.extract_strided_slice %47 {offsets = [0, 0], sizes = [1, 32], strides = [1, 1]} : vector<1x384xf32> to vector<1x32xf32>
    %50 = arith.addf %48, %49 : vector<1x32xf32>
    %51 = arith.negf %50 : vector<1x32xf32>
    %52 = math.exp %51 : vector<1x32xf32>
    %cst_29 = arith.constant 1.000000e+00 : f32
    %53 = vector.broadcast %cst_29 : f32 to vector<1x32xf32>
    %54 = arith.addf %53, %52 : vector<1x32xf32>
    %55 = arith.divf %53, %54 : vector<1x32xf32>
    %56 = vector.extract_strided_slice %44 {offsets = [0, 128], sizes = [1, 32], strides = [1, 1]} : vector<1x384xf32> to vector<1x32xf32>
    %57 = vector.extract_strided_slice %47 {offsets = [0, 128], sizes = [1, 32], strides = [1, 1]} : vector<1x384xf32> to vector<1x32xf32>
    %58 = arith.addf %56, %57 : vector<1x32xf32>
    %59 = arith.negf %58 : vector<1x32xf32>
    %60 = math.exp %59 : vector<1x32xf32>
    %cst_30 = arith.constant 1.000000e+00 : f32
    %61 = vector.broadcast %cst_30 : f32 to vector<1x32xf32>
    %62 = arith.addf %61, %60 : vector<1x32xf32>
    %63 = arith.divf %61, %62 : vector<1x32xf32>
    %64 = vector.extract_strided_slice %44 {offsets = [0, 256], sizes = [1, 32], strides = [1, 1]} : vector<1x384xf32> to vector<1x32xf32>
    %65 = vector.extract_strided_slice %47 {offsets = [0, 256], sizes = [1, 32], strides = [1, 1]} : vector<1x384xf32> to vector<1x32xf32>
    %66 = arith.mulf %55, %65 : vector<1x32xf32>
    %67 = arith.addf %64, %66 : vector<1x32xf32>
    %68 = math.tanh %67 : vector<1x32xf32>
    %cst_31 = arith.constant 1.000000e+00 : f32
    %69 = vector.broadcast %cst_31 : f32 to vector<1x32xf32>
    %70 = arith.subf %69, %63 : vector<1x32xf32>
    %71 = arith.mulf %70, %68 : vector<1x32xf32>
    %72 = arith.mulf %63, %3 : vector<1x32xf32>
    %73 = arith.addf %71, %72 : vector<1x32xf32>
    %c0_32 = arith.constant 0 : index
    %c0_33 = arith.constant 0 : index
    %74 = vector.load %arg17[%c0_32, %c0_33] : memref<1x32xf32, #tpu.memory_space<vmem>>, vector<1x32xf32>
    tpu.vector_store %arg17[%c0_32, %c0_33], %73 {strides = array<i32>} : memref<1x32xf32, #tpu.memory_space<vmem>>, vector<1x32xf32>,
    %75 = arith.index_cast %arg0 : i32 to index
    %c0_34 = arith.constant 0 : index
    %76 = vector.load %arg15[%75, %c0_34] : memref<8x32xf32, #tpu.memory_space<vmem>>, vector<1x32xf32>
    tpu.vector_store %arg15[%75, %c0_34], %73 {strides = array<i32>} : memref<8x32xf32, #tpu.memory_space<vmem>>, vector<1x32xf32>,
    %77 = arith.truncf %73 : vector<1x32xf32> to vector<1x32xbf16>
    %c0_35 = arith.constant 0 : index
    %c0_36 = arith.constant 0 : index
    %78 = vector.load %arg12[%c0_35, %c0_36] : memref<32x128xbf16, #tpu.memory_space<vmem>>, vector<32x128xbf16>
    %cst_37 = arith.constant dense<0.000000e+00> : vector<1x128xf32>
    %79 = tpu.matmul %77, %78, %cst_37 {dimension_numbers = #tpu.dot_dimension_numbers<[1], [0], [0], [1], [0, 0, 1, 1], [], []>} : vector<1x32xbf16>, vector<32x128xbf16>, vector<1x128xf32> -> vector<1x128xf32>
    %c0_38 = arith.constant 0 : index
    %c0_39 = arith.constant 0 : index
    %80 = vector.load %arg13[%c0_38, %c0_39] : memref<1x128xf32, #tpu.memory_space<vmem>>, vector<1x128xf32>
    %81 = arith.addf %79, %80 : vector<1x128xf32>
    %cst_40 = arith.constant dense<0xFF800000> : vector<1xf32>
    %82 = vector.multi_reduction <maximumf>, %81, %cst_40 [1] : vector<1x128xf32> to vector<1xf32>
    %83 = vector.shape_cast %82 : vector<1xf32> to vector<1x1xf32>
    %84 = vector.broadcast %83 : vector<1x1xf32> to vector<1x128xf32>
    %85 = arith.subf %81, %84 : vector<1x128xf32>
    %86 = math.exp %85 : vector<1x128xf32>
    %cst_41 = arith.constant dense<0.000000e+00> : vector<1xf32>
    %87 = vector.multi_reduction <add>, %86, %cst_41 [1] : vector<1x128xf32> to vector<1xf32>
    %88 = vector.shape_cast %87 : vector<1xf32> to vector<1x1xf32>
    %89 = math.log %88 : vector<1x1xf32>
    %90 = vector.broadcast %89 : vector<1x1xf32> to vector<1x128xf32>
    %91 = arith.subf %85, %90 : vector<1x128xf32>
    %92 = arith.index_cast %arg0 : i32 to index
    %c0_42 = arith.constant 0 : index
    %93 = vector.load %arg14[%92, %c0_42] : memref<8x128xf32, #tpu.memory_space<vmem>>, vector<1x128xf32>
    tpu.vector_store %arg14[%92, %c0_42], %91 {strides = array<i32>} : memref<8x128xf32, #tpu.memory_space<vmem>>, vector<1x128xf32>,
    return
  }
  func.func @transform_0(%arg0: i32) -> (i32, i32) {
    %c0_i32 = arith.constant 0 : i32
    %c0_i32_0 = arith.constant 0 : i32
    %c0_i32_1 = arith.constant 0 : i32
    return %c0_i32, %c0_i32_0 : i32, i32
  }
  func.func @transform_1(%arg0: i32) -> (i32, i32) {
    %c0_i32 = arith.constant 0 : i32
    %c0_i32_0 = arith.constant 0 : i32
    %c0_i32_1 = arith.constant 0 : i32
    return %c0_i32, %c0_i32_0 : i32, i32
  }
  func.func @transform_2(%arg0: i32) -> (i32, i32) {
    %c0_i32 = arith.constant 0 : i32
    %c0_i32_0 = arith.constant 0 : i32
    %c0_i32_1 = arith.constant 0 : i32
    return %c0_i32, %c0_i32_0 : i32, i32
  }
  func.func @transform_3(%arg0: i32) -> (i32, i32) {
    %c0_i32 = arith.constant 0 : i32
    %c0_i32_0 = arith.constant 0 : i32
    %c0_i32_1 = arith.constant 0 : i32
    return %c0_i32, %c0_i32_0 : i32, i32
  }
  func.func @transform_4(%arg0: i32) -> (i32, i32) {
    %c0_i32 = arith.constant 0 : i32
    %c0_i32_0 = arith.constant 0 : i32
    %c0_i32_1 = arith.constant 0 : i32
    return %c0_i32, %c0_i32_0 : i32, i32
  }
  func.func @transform_5(%arg0: i32) -> (i32, i32) {
    %c0_i32 = arith.constant 0 : i32
    %c0_i32_0 = arith.constant 0 : i32
    %c0_i32_1 = arith.constant 0 : i32
    return %c0_i32, %c0_i32_0 : i32, i32
  }
  func.func @transform_6(%arg0: i32) -> (i32, i32) {
    %c0_i32 = arith.constant 0 : i32
    %c0_i32_0 = arith.constant 0 : i32
    %c0_i32_1 = arith.constant 0 : i32
    return %c0_i32, %c0_i32_0 : i32, i32
  }
  func.func @transform_7(%arg0: i32) -> (i32, i32) {
    %c0_i32 = arith.constant 0 : i32
    %c0_i32_0 = arith.constant 0 : i32
    %c0_i32_1 = arith.constant 0 : i32
    return %c0_i32, %c0_i32_0 : i32, i32
  }
  func.func @transform_8(%arg0: i32) -> (i32, i32) {
    %c0_i32 = arith.constant 0 : i32
    %c0_i32_0 = arith.constant 0 : i32
    %c0_i32_1 = arith.constant 0 : i32
    return %c0_i32, %c0_i32_0 : i32, i32
  }
  func.func @transform_9(%arg0: i32) -> (i32, i32) {
    %c0_i32 = arith.constant 0 : i32
    %c0_i32_0 = arith.constant 0 : i32
    %c0_i32_1 = arith.constant 0 : i32
    return %c0_i32, %c0_i32_0 : i32, i32
  }
  func.func @transform_10(%arg0: i32) -> (i32, i32) {
    %c0_i32 = arith.constant 0 : i32
    %c0_i32_0 = arith.constant 0 : i32
    %c0_i32_1 = arith.constant 0 : i32
    return %c0_i32, %c0_i32_0 : i32, i32
  }
  func.func @transform_11(%arg0: i32) -> (i32, i32) {
    %c0_i32 = arith.constant 0 : i32
    %c0_i32_0 = arith.constant 0 : i32
    %c0_i32_1 = arith.constant 0 : i32
    return %c0_i32, %c0_i32_0 : i32, i32
  }
  func.func @transform_12(%arg0: i32) -> (i32, i32) {
    %c0_i32 = arith.constant 0 : i32
    %c0_i32_0 = arith.constant 0 : i32
    %c0_i32_1 = arith.constant 0 : i32
    return %c0_i32, %c0_i32_0 : i32, i32
  }
  func.func @transform_13(%arg0: i32) -> (i32, i32) {
    %c0_i32 = arith.constant 0 : i32
    %c0_i32_0 = arith.constant 0 : i32
    %c0_i32_1 = arith.constant 0 : i32
    return %c0_i32, %c0_i32_0 : i32, i32
  }
  func.func @transform_14(%arg0: i32) -> (i32, i32) {
    %c0_i32 = arith.constant 0 : i32
    %c0_i32_0 = arith.constant 0 : i32
    %c0_i32_1 = arith.constant 0 : i32
    return %c0_i32, %c0_i32_0 : i32, i32
  }
  func.func @transform_15(%arg0: i32) -> (i32, i32) {
    %c0_i32 = arith.constant 0 : i32
    %c0_i32_0 = arith.constant 0 : i32
    %c0_i32_1 = arith.constant 0 : i32
    return %c0_i32, %c0_i32_0 : i32, i32
  }
}

module attributes {stable_mosaic.version = 11 : i64} {
  func.func @kernel(%arg0: i32, %arg1: memref<8x32xf32, #tpu.memory_space<vmem>>, %arg2: memref<1x32xf32, #tpu.memory_space<vmem>>, %arg3: memref<128x32xbf16, #tpu.memory_space<vmem>>, %arg4: memref<32x160xbf16, #tpu.memory_space<vmem>>, %arg5: memref<32x512xbf16, #tpu.memory_space<vmem>>, %arg6: memref<1x128xf32, #tpu.memory_space<vmem>>, %arg7: memref<32x32xbf16, #tpu.memory_space<vmem>>, %arg8: memref<1x32xf32, #tpu.memory_space<vmem>>, %arg9: memref<32x384xbf16, #tpu.memory_space<vmem>>, %arg10: memref<1x384xf32, #tpu.memory_space<vmem>>, %arg11: memref<1x384xf32, #tpu.memory_space<vmem>>, %arg12: memref<32x128xbf16, #tpu.memory_space<vmem>>, %arg13: memref<1x128xf32, #tpu.memory_space<vmem>>, %arg14: memref<8x128xf32, #tpu.memory_space<vmem>>, %arg15: memref<8x32xf32, #tpu.memory_space<vmem>>, %arg16: memref<8x128xf32, #tpu.memory_space<vmem>>, %arg17: memref<1x32xf32, #tpu.memory_space<vmem>>) attributes {dimension_semantics = [#tpu.dimension_semantics<arbitrary>], iteration_bounds = array<i64: 8>, scalar_prefetch = 0 : i64, scratch_operands = 1 : i64, tpu.core_type = #tpu.core_type<tc>, window_params = [{pipeline_mode = #tpu.pipeline_mode<synchronous>, transform_indices = @transform_0, window_bounds = array<i64: 8, 32>}, {pipeline_mode = #tpu.pipeline_mode<synchronous>, transform_indices = @transform_1, window_bounds = array<i64: 1, 32>}, {pipeline_mode = #tpu.pipeline_mode<synchronous>, transform_indices = @transform_2, window_bounds = array<i64: 128, 32>}, {pipeline_mode = #tpu.pipeline_mode<synchronous>, transform_indices = @transform_3, window_bounds = array<i64: 32, 160>}, {pipeline_mode = #tpu.pipeline_mode<synchronous>, transform_indices = @transform_4, window_bounds = array<i64: 32, 512>}, {pipeline_mode = #tpu.pipeline_mode<synchronous>, transform_indices = @transform_5, window_bounds = array<i64: 1, 128>}, {pipeline_mode = #tpu.pipeline_mode<synchronous>, transform_indices = @transform_6, window_bounds = array<i64: 32, 32>}, {pipeline_mode = #tpu.pipeline_mode<synchronous>, transform_indices = @transform_7, window_bounds = array<i64: 1, 32>}, {pipeline_mode = #tpu.pipeline_mode<synchronous>, transform_indices = @transform_8, window_bounds = array<i64: 32, 384>}, {pipeline_mode = #tpu.pipeline_mode<synchronous>, transform_indices = @transform_9, window_bounds = array<i64: 1, 384>}, {pipeline_mode = #tpu.pipeline_mode<synchronous>, transform_indices = @transform_10, window_bounds = array<i64: 1, 384>}, {pipeline_mode = #tpu.pipeline_mode<synchronous>, transform_indices = @transform_11, window_bounds = array<i64: 32, 128>}, {pipeline_mode = #tpu.pipeline_mode<synchronous>, transform_indices = @transform_12, window_bounds = array<i64: 1, 128>}, {pipeline_mode = #tpu.pipeline_mode<synchronous>, transform_indices = @transform_13, window_bounds = array<i64: 8, 128>}, {pipeline_mode = #tpu.pipeline_mode<synchronous>, transform_indices = @transform_14, window_bounds = array<i64: 8, 32>}, {pipeline_mode = #tpu.pipeline_mode<synchronous>, transform_indices = @transform_15, window_bounds = array<i64: 8, 128>}]} {
    %c0_i32 = arith.constant 0 : i32
    %0 = arith.cmpi eq, %arg0, %c0_i32 : i32
    %1 = arith.extui %0 : i1 to i32
    %c0_i32_0 = arith.constant 0 : i32
    %2 = arith.cmpi ne, %1, %c0_i32_0 : i32
    scf.if %2 {
      %c0_43 = arith.constant 0 : index
      %c0_44 = arith.constant 0 : index
      %94 = vector.load %arg2[%c0_43, %c0_44] : memref<1x32xf32, #tpu.memory_space<vmem>>, vector<1x32xf32>
      %c0_45 = arith.constant 0 : index
      %c0_46 = arith.constant 0 : index
      %95 = vector.load %arg17[%c0_45, %c0_46] : memref<1x32xf32, #tpu.memory_space<vmem>>, vector<1x32xf32>
      tpu.vector_store %arg17[%c0_45, %c0_46], %94 {strides = array<i32>} : memref<1x32xf32, #tpu.memory_space<vmem>>, vector<1x32xf32>,
    } else {
    }
    %c0 = arith.constant 0 : index
    %c0_1 = arith.constant 0 : index
    %3 = vector.load %arg17[%c0, %c0_1] : memref<1x32xf32, #tpu.memory_space<vmem>>, vector<1x32xf32>
    %4 = arith.index_cast %arg0 : i32 to index
    %c0_2 = arith.constant 0 : index
    %5 = vector.load %arg1[%4, %c0_2] : memref<8x32xf32, #tpu.memory_space<vmem>>, vector<1x32xf32>
    %6 = arith.truncf %5 : vector<1x32xf32> to vector<1x32xbf16>
    %7 = arith.truncf %3 : vector<1x32xf32> to vector<1x32xbf16>
    %c0_3 = arith.constant 0 : index
    %c0_4 = arith.constant 0 : index
    %8 = vector.load %arg4[%c0_3, %c0_4] : memref<32x160xbf16, #tpu.memory_space<vmem>>, vector<32x160xbf16>
    %cst = arith.constant dense<0.000000e+00> : vector<1x160xf32>
    %9 = tpu.matmul %6, %8, %cst {dimension_numbers = #tpu.dot_dimension_numbers<[1], [0], [0], [1], [0, 0, 1, 1], [], []>} : vector<1x32xbf16>, vector<32x160xbf16>, vector<1x160xf32> -> vector<1x160xf32>
    %c0_5 = arith.constant 0 : index
    %c0_6 = arith.constant 0 : index
    %10 = vector.load %arg5[%c0_5, %c0_6] : memref<32x512xbf16, #tpu.memory_space<vmem>>, vector<32x512xbf16>
    %cst_7 = arith.constant dense<0.000000e+00> : vector<1x512xf32>
    %11 = tpu.matmul %7, %10, %cst_7 {dimension_numbers = #tpu.dot_dimension_numbers<[1], [0], [0], [1], [0, 0, 1, 1], [], []>} : vector<1x32xbf16>, vector<32x512xbf16>, vector<1x512xf32> -> vector<1x512xf32>
    %12 = vector.extract_strided_slice %9 {offsets = [0, 0], sizes = [1, 128], strides = [1, 1]} : vector<1x160xf32> to vector<1x128xf32>
    %13 = vector.extract_strided_slice %11 {offsets = [0, 0], sizes = [1, 128], strides = [1, 1]} : vector<1x512xf32> to vector<1x128xf32>
    %14 = arith.addf %12, %13 : vector<1x128xf32>
    %c0_8 = arith.constant 0 : index
    %c0_9 = arith.constant 0 : index
    %15 = vector.load %arg6[%c0_8, %c0_9] : memref<1x128xf32, #tpu.memory_space<vmem>>, vector<1x128xf32>
    %16 = arith.addf %14, %15 : vector<1x128xf32>
    %cst_10 = arith.constant dense<0xFF800000> : vector<1xf32>
    %17 = vector.multi_reduction <maximumf>, %16, %cst_10 [1] : vector<1x128xf32> to vector<1xf32>
    %18 = vector.shape_cast %17 : vector<1xf32> to vector<1x1xf32>
    %19 = vector.broadcast %18 : vector<1x1xf32> to vector<1x128xf32>
    %20 = arith.subf %16, %19 : vector<1x128xf32>
    %21 = math.exp %20 : vector<1x128xf32>
    %cst_11 = arith.constant dense<0.000000e+00> : vector<1xf32>
    %22 = vector.multi_reduction <add>, %21, %cst_11 [1] : vector<1x128xf32> to vector<1xf32>
    %23 = vector.shape_cast %22 : vector<1xf32> to vector<1x1xf32>
    %24 = vector.broadcast %23 : vector<1x1xf32> to vector<1x128xf32>
    %25 = arith.divf %21, %24 : vector<1x128xf32>
    %26 = arith.index_cast %arg0 : i32 to index
    %c0_12 = arith.constant 0 : index
    %27 = vector.load %arg16[%26, %c0_12] : memref<8x128xf32, #tpu.memory_space<vmem>>, vector<1x128xf32>
    tpu.vector_store %arg16[%26, %c0_12], %25 {strides = array<i32>} : memref<8x128xf32, #tpu.memory_space<vmem>>, vector<1x128xf32>,
    %28 = arith.truncf %25 : vector<1x128xf32> to vector<1x128xbf16>
    %c0_13 = arith.constant 0 : index
    %c0_14 = arith.constant 0 : index
    %29 = vector.load %arg3[%c0_13, %c0_14] : memref<128x32xbf16, #tpu.memory_space<vmem>>, vector<128x32xbf16>
    %cst_15 = arith.constant dense<0.000000e+00> : vector<1x32xf32>
    %30 = tpu.matmul %28, %29, %cst_15 {dimension_numbers = #tpu.dot_dimension_numbers<[1], [0], [0], [1], [0, 0, 1, 1], [], []>} : vector<1x128xbf16>, vector<128x32xbf16>, vector<1x32xf32> -> vector<1x32xf32>
    %31 = vector.extract_strided_slice %9 {offsets = [0, 128], sizes = [1, 32], strides = [1, 1]} : vector<1x160xf32> to vector<1x32xf32>
    %32 = arith.truncf %30 : vector<1x32xf32> to vector<1x32xbf16>
    %c0_16 = arith.constant 0 : index
    %c0_17 = arith.constant 0 : index
    %33 = vector.load %arg7[%c0_16, %c0_17] : memref<32x32xbf16, #tpu.memory_space<vmem>>, vector<32x32xbf16>
    %cst_18 = arith.constant dense<0.000000e+00> : vector<1x32xf32>
    %34 = tpu.matmul %32, %33, %cst_18 {dimension_numbers = #tpu.dot_dimension_numbers<[1], [0], [0], [1], [0, 0, 1, 1], [], []>} : vector<1x32xbf16>, vector<32x32xbf16>, vector<1x32xf32> -> vector<1x32xf32>
    %35 = arith.addf %31, %34 : vector<1x32xf32>
    %c0_19 = arith.constant 0 : index
    %c0_20 = arith.constant 0 : index
    %36 = vector.load %arg8[%c0_19, %c0_20] : memref<1x32xf32, #tpu.memory_space<vmem>>, vector<1x32xf32>
    %37 = arith.addf %35, %36 : vector<1x32xf32>
    %cst_21 = arith.constant 0.000000e+00 : f32
    %38 = vector.broadcast %cst_21 : f32 to vector<1x32xf32>
    %39 = arith.maximumf %37, %38 : vector<1x32xf32>
    %40 = arith.truncf %39 : vector<1x32xf32> to vector<1x32xbf16>
    %c0_22 = arith.constant 0 : index
    %c0_23 = arith.constant 0 : index
    %41 = vector.load %arg9[%c0_22, %c0_23] : memref<32x384xbf16, #tpu.memory_space<vmem>>, vector<32x384xbf16>
    %cst_24 = arith.constant dense<0.000000e+00> : vector<1x384xf32>
    %42 = tpu.matmul %40, %41, %cst_24 {dimension_numbers = #tpu.dot_dimension_numbers<[1], [0], [0], [1], [0, 0, 1, 1], [], []>} : vector<1x32xbf16>, vector<32x384xbf16>, vector<1x384xf32> -> vector<1x384xf32>
    %c0_25 = arith.constant 0 : index
    %c0_26 = arith.constant 0 : index
    %43 = vector.load %arg10[%c0_25, %c0_26] : memref<1x384xf32, #tpu.memory_space<vmem>>, vector<1x384xf32>
    %44 = arith.addf %42, %43 : vector<1x384xf32>
    %45 = vector.extract_strided_slice %11 {offsets = [0, 128], sizes = [1, 384], strides = [1, 1]} : vector<1x512xf32> to vector<1x384xf32>
    %c0_27 = arith.constant 0 : index
    %c0_28 = arith.constant 0 : index
    %46 = vector.load %arg11[%c0_27, %c0_28] : memref<1x384xf32, #tpu.memory_space<vmem>>, vector<1x384xf32>
    %47 = arith.addf %45, %46 : vector<1x384xf32>
    %48 = vector.extract_strided_slice %44 {offsets = [0, 0], sizes = [1, 32], strides = [1, 1]} : vector<1x384xf32> to vector<1x32xf32>
    %49 = vector.extract_strided_slice %47 {offsets = [0, 0], sizes = [1, 32], strides = [1, 1]} : vector<1x384xf32> to vector<1x32xf32>
    %50 = arith.addf %48, %49 : vector<1x32xf32>
    %51 = arith.negf %50 : vector<1x32xf32>
    %52 = math.exp %51 : vector<1x32xf32>
    %cst_29 = arith.constant 1.000000e+00 : f32
    %53 = vector.broadcast %cst_29 : f32 to vector<1x32xf32>
    %54 = arith.addf %53, %52 : vector<1x32xf32>
    %55 = arith.divf %53, %54 : vector<1x32xf32>
    %56 = vector.extract_strided_slice %44 {offsets = [0, 128], sizes = [1, 32], strides = [1, 1]} : vector<1x384xf32> to vector<1x32xf32>
    %57 = vector.extract_strided_slice %47 {offsets = [0, 128], sizes = [1, 32], strides = [1, 1]} : vector<1x384xf32> to vector<1x32xf32>
    %58 = arith.addf %56, %57 : vector<1x32xf32>
    %59 = arith.negf %58 : vector<1x32xf32>
    %60 = math.exp %59 : vector<1x32xf32>
    %cst_30 = arith.constant 1.000000e+00 : f32
    %61 = vector.broadcast %cst_30 : f32 to vector<1x32xf32>
    %62 = arith.addf %61, %60 : vector<1x32xf32>
    %63 = arith.divf %61, %62 : vector<1x32xf32>
    %64 = vector.extract_strided_slice %44 {offsets = [0, 256], sizes = [1, 32], strides = [1, 1]} : vector<1x384xf32> to vector<1x32xf32>
    %65 = vector.extract_strided_slice %47 {offsets = [0, 256], sizes = [1, 32], strides = [1, 1]} : vector<1x384xf32> to vector<1x32xf32>
    %66 = arith.mulf %55, %65 : vector<1x32xf32>
    %67 = arith.addf %64, %66 : vector<1x32xf32>
    %68 = math.tanh %67 : vector<1x32xf32>
    %cst_31 = arith.constant 1.000000e+00 : f32
    %69 = vector.broadcast %cst_31 : f32 to vector<1x32xf32>
    %70 = arith.subf %69, %63 : vector<1x32xf32>
    %71 = arith.mulf %70, %68 : vector<1x32xf32>
    %72 = arith.mulf %63, %3 : vector<1x32xf32>
    %73 = arith.addf %71, %72 : vector<1x32xf32>
    %c0_32 = arith.constant 0 : index
    %c0_33 = arith.constant 0 : index
    %74 = vector.load %arg17[%c0_32, %c0_33] : memref<1x32xf32, #tpu.memory_space<vmem>>, vector<1x32xf32>
    tpu.vector_store %arg17[%c0_32, %c0_33], %73 {strides = array<i32>} : memref<1x32xf32, #tpu.memory_space<vmem>>, vector<1x32xf32>,
    %75 = arith.index_cast %arg0 : i32 to index
    %c0_34 = arith.constant 0 : index
    %76 = vector.load %arg15[%75, %c0_34] : memref<8x32xf32, #tpu.memory_space<vmem>>, vector<1x32xf32>
    tpu.vector_store %arg15[%75, %c0_34], %73 {strides = array<i32>} : memref<8x32xf32, #tpu.memory_space<vmem>>, vector<1x32xf32>,
    %77 = arith.truncf %73 : vector<1x32xf32> to vector<1x32xbf16>
    %c0_35 = arith.constant 0 : index
    %c0_36 = arith.constant 0 : index
    %78 = vector.load %arg12[%c0_35, %c0_36] : memref<32x128xbf16, #tpu.memory_space<vmem>>, vector<32x128xbf16>
    %cst_37 = arith.constant dense<0.000000e+00> : vector<1x128xf32>
    %79 = tpu.matmul %77, %78, %cst_37 {dimension_numbers = #tpu.dot_dimension_numbers<[1], [0], [0], [1], [0, 0, 1, 1], [], []>} : vector<1x32xbf16>, vector<32x128xbf16>, vector<1x128xf32> -> vector<1x128xf32>
    %c0_38 = arith.constant 0 : index
    %c0_39 = arith.constant 0 : index
    %80 = vector.load %arg13[%c0_38, %c0_39] : memref<1x128xf32, #tpu.memory_space<vmem>>, vector<1x128xf32>
    %81 = arith.addf %79, %80 : vector<1x128xf32>
    %cst_40 = arith.constant dense<0xFF800000> : vector<1xf32>
    %82 = vector.multi_reduction <maximumf>, %81, %cst_40 [1] : vector<1x128xf32> to vector<1xf32>
    %83 = vector.shape_cast %82 : vector<1xf32> to vector<1x1xf32>
    %84 = vector.broadcast %83 : vector<1x1xf32> to vector<1x128xf32>
    %85 = arith.subf %81, %84 : vector<1x128xf32>
    %86 = math.exp %85 : vector<1x128xf32>
    %cst_41 = arith.constant dense<0.000000e+00> : vector<1xf32>
    %87 = vector.multi_reduction <add>, %86, %cst_41 [1] : vector<1x128xf32> to vector<1xf32>
    %88 = vector.shape_cast %87 : vector<1xf32> to vector<1x1xf32>
    %89 = math.log %88 : vector<1x1xf32>
    %90 = vector.broadcast %89 : vector<1x1xf32> to vector<1x128xf32>
    %91 = arith.subf %85, %90 : vector<1x128xf32>
    %92 = arith.index_cast %arg0 : i32 to index
    %c0_42 = arith.constant 0 : index
    %93 = vector.load %arg14[%92, %c0_42] : memref<8x128xf32, #tpu.memory_space<vmem>>, vector<1x128xf32>
    tpu.vector_store %arg14[%92, %c0_42], %91 {strides = array<i32>} : memref<8x128xf32, #tpu.memory_space<vmem>>, vector<1x128xf32>,
    return
  }
  func.func @transform_0(%arg0: i32) -> (i32, i32) {
    %c0_i32 = arith.constant 0 : i32
    %c0_i32_0 = arith.constant 0 : i32
    %c0_i32_1 = arith.constant 0 : i32
    return %c0_i32, %c0_i32_0 : i32, i32
  }
  func.func @transform_1(%arg0: i32) -> (i32, i32) {
    %c0_i32 = arith.constant 0 : i32
    %c0_i32_0 = arith.constant 0 : i32
    %c0_i32_1 = arith.constant 0 : i32
    return %c0_i32, %c0_i32_0 : i32, i32
  }
  func.func @transform_2(%arg0: i32) -> (i32, i32) {
    %c0_i32 = arith.constant 0 : i32
    %c0_i32_0 = arith.constant 0 : i32
    %c0_i32_1 = arith.constant 0 : i32
    return %c0_i32, %c0_i32_0 : i32, i32
  }
  func.func @transform_3(%arg0: i32) -> (i32, i32) {
    %c0_i32 = arith.constant 0 : i32
    %c0_i32_0 = arith.constant 0 : i32
    %c0_i32_1 = arith.constant 0 : i32
    return %c0_i32, %c0_i32_0 : i32, i32
  }
  func.func @transform_4(%arg0: i32) -> (i32, i32) {
    %c0_i32 = arith.constant 0 : i32
    %c0_i32_0 = arith.constant 0 : i32
    %c0_i32_1 = arith.constant 0 : i32
    return %c0_i32, %c0_i32_0 : i32, i32
  }
  func.func @transform_5(%arg0: i32) -> (i32, i32) {
    %c0_i32 = arith.constant 0 : i32
    %c0_i32_0 = arith.constant 0 : i32
    %c0_i32_1 = arith.constant 0 : i32
    return %c0_i32, %c0_i32_0 : i32, i32
  }
  func.func @transform_6(%arg0: i32) -> (i32, i32) {
    %c0_i32 = arith.constant 0 : i32
    %c0_i32_0 = arith.constant 0 : i32
    %c0_i32_1 = arith.constant 0 : i32
    return %c0_i32, %c0_i32_0 : i32, i32
  }
  func.func @transform_7(%arg0: i32) -> (i32, i32) {
    %c0_i32 = arith.constant 0 : i32
    %c0_i32_0 = arith.constant 0 : i32
    %c0_i32_1 = arith.constant 0 : i32
    return %c0_i32, %c0_i32_0 : i32, i32
  }
  func.func @transform_8(%arg0: i32) -> (i32, i32) {
    %c0_i32 = arith.constant 0 : i32
    %c0_i32_0 = arith.constant 0 : i32
    %c0_i32_1 = arith.constant 0 : i32
    return %c0_i32, %c0_i32_0 : i32, i32
  }
  func.func @transform_9(%arg0: i32) -> (i32, i32) {
    %c0_i32 = arith.constant 0 : i32
    %c0_i32_0 = arith.constant 0 : i32
    %c0_i32_1 = arith.constant 0 : i32
    return %c0_i32, %c0_i32_0 : i32, i32
  }
  func.func @transform_10(%arg0: i32) -> (i32, i32) {
    %c0_i32 = arith.constant 0 : i32
    %c0_i32_0 = arith.constant 0 : i32
    %c0_i32_1 = arith.constant 0 : i32
    return %c0_i32, %c0_i32_0 : i32, i32
  }
  func.func @transform_11(%arg0: i32) -> (i32, i32) {
    %c0_i32 = arith.constant 0 : i32
    %c0_i32_0 = arith.constant 0 : i32
    %c0_i32_1 = arith.constant 0 : i32
    return %c0_i32, %c0_i32_0 : i32, i32
  }
  func.func @transform_12(%arg0: i32) -> (i32, i32) {
    %c0_i32 = arith.constant 0 : i32
    %c0_i32_0 = arith.constant 0 : i32
    %c0_i32_1 = arith.constant 0 : i32
    return %c0_i32, %c0_i32_0 : i32, i32
  }
  func.func @transform_13(%arg0: i32) -> (i32, i32) {
    %c0_i32 = arith.constant 0 : i32
    %c0_i32_0 = arith.constant 0 : i32
    %c0_i32_1 = arith.constant 0 : i32
    return %c0_i32, %c0_i32_0 : i32, i32
  }
  func.func @transform_14(%arg0: i32) -> (i32, i32) {
    %c0_i32 = arith.constant 0 : i32
    %c0_i32_0 = arith.constant 0 : i32
    %c0_i32_1 = arith.constant 0 : i32
    return %c0_i32, %c0_i32_0 : i32, i32
  }
  func.func @transform_15(%arg0: i32) -> (i32, i32) {
    %c0_i32 = arith.constant 0 : i32
    %c0_i32_0 = arith.constant 0 : i32
    %c0_i32_1 = arith.constant 0 : i32
    return %c0_i32, %c0_i32_0 : i32, i32
  }
}

</mosaic_0001>

<bundles_post_ra>
// kernel: tpu_custom_call.1
= control target key start
LH: loop header
LB: loop body
LE: loop exit
PB: predicated region body
PF: predicated region fallthrough
CT: control target
= control target key end

     0   :  { %s2304_s0 = inlined_call_operand.hbm [shape: f32[8,32], index: 0, kind: input, shape index: {}]   ;;  %s2305_s1 = inlined_call_operand.hbm [shape: f32[1,32], index: 1, kind: input, shape index: {}]   ;;  %s2306_s2 = inlined_call_operand.vmem [shape: bf16[128,32], index: 2, kind: input, shape index: {}]   ;;  %s2307_s3 = inlined_call_operand.hbm [shape: bf16[32,160], index: 3, kind: input, shape index: {}]   ;;  %s2308_s4 = inlined_call_operand.vmem [shape: bf16[32,512], index: 4, kind: input, shape index: {}]   ;;  %s2309_s5 = inlined_call_operand.hbm [shape: f32[1,128], index: 5, kind: input, shape index: {}]   ;;  %s2310_s6 = inlined_call_operand.vmem [shape: bf16[32,32], index: 6, kind: input, shape index: {}]   ;;  %s2311_s7 = inlined_call_operand.vmem [shape: f32[1,32], index: 7, kind: input, shape index: {}]   ;;  %s2312_s8 = inlined_call_operand.hbm [shape: bf16[32,384], index: 8, kind: input, shape index: {}]   ;;  %s2313_s9 = inlined_call_operand.vmem [shape: f32[1,384], index: 9, kind: input, shape index: {}]   ;;  %s2314_s10 = inlined_call_operand.vmem [shape: f32[1,384], index: 10, kind: input, shape index: {}]   ;;  %s2315_s11 = inlined_call_operand.vmem [shape: bf16[32,128], index: 11, kind: input, shape index: {}]   ;;  %s2316_s12 = inlined_call_operand.vmem [shape: f32[1,128], index: 12, kind: input, shape index: {}]   ;;  %s2317_s13 = inlined_call_operand.hbm [shape: f32[8,128], index: 13, kind: output, shape index: {0}]   ;;  %s2318_s14 = inlined_call_operand.hbm [shape: f32[8,32], index: 14, kind: output, shape index: {1}]   ;;  %s2319_s15 = inlined_call_operand.hbm [shape: f32[8,128], index: 15, kind: output, shape index: {2}]  }
   0x1   :  { %2325 = sst [smem:[#allocation21_spill]] %s2304_s0 }
   0x2   :  { %2326 = sst [smem:[#allocation22_spill]] %s2317_s13 }
   0x3   :  { %2327 = sst [smem:[#allocation23_spill]] %s2318_s14 }
   0x4   :  { %2328 = sst [smem:[#allocation24_spill]] %s2319_s15 }
   0x5   :  { %21 = vsyncpa [#allocation4], 0 }
   0x6   :  { %22 = vsyncpa [#allocation7], 0 }
   0x7   :  { %23 = vsyncpa [#allocation10], 0 }
   0x8   :  { %24 = vsyncpa [#allocation5], 0 }
   0x9   :  { %25 = vsyncpa [#allocation14], 0  ;;  %s1941_s18 = smov 0  }
   0xa LB: > { %s1846_s19 = smov [#allocation6]   ;;  %s1947_s21 = sadd.s32 4294967295, %s1844_s18   ;;  %s1844_s18 = sphi %s1941_s18, %s31_s18  }
   0xb   : > { %s396_s20 = sshll.u32 %s1846_s19, 4  ;;  %p1319_p0 = scmp.ge.s32.totalorder %s1844_s18, 1  ;;  %s1953_s20 = int_to_ptr.vmem [resolvable:$true] %s396_s20 }
   0xc   : > { %p372_p1 = scmp.lt.s32.totalorder %s1844_s18, 9  ;;  %p2323_p3 = scmp.eq.s32.totalorder %s1947_s21, 0 }
   0xd   : > { %s1847_s23 = smov [#allocation9]   ;;  %s1848_s25 = smov [#allocation3]  }
   0xe   : > { %p1955_p4 = pnand %p1319_p0, %p372_p1  ;;  %s426_s24 = sshll.u32 %s1847_s23, 4  ;;  %s1961_s24 = int_to_ptr.vmem [resolvable:$true] %s426_s24 }
   0xf   : > { %s385_s26 = sshll.u32 %s1848_s25, 4  ;;  %s1849_s28 = smov [#allocation8]   ;;  %s1969_s26 = int_to_ptr.vmem [resolvable:$true] %s385_s26 }
  0x10   : > { %s2329_s22 = scalar_select %p1955_p4, 1, 0 }
  0x11   : > { %p1489_p5 = pneg %p1955_p4  ;;  %s409_s29 = sshll.u32 %s1849_s28, 4  ;;  %s1971_s29 = int_to_ptr.vmem [resolvable:$true] %s409_s29 }
  0x12   : > { %s1600_s17 = scalar_lea.hbm %s2305_s1, 16 }
  0x13   : > { %p1965_p6 = pnand %p2323_p3, %p1489_p5  ;;  %p1601_p7 = scmp.ne.s32.totalorder %s2305_s1, %s1600_s17 }
  0x14   : > { %p1607_p11 = scmp.lt.u32.totalorder %s1600_s17, %s2305_s1 }
  0x15   : > { %p1981_p8 = pneg %p1965_p6 }
  0x17   : > { %p1603_p9 = pnand %p1981_p8, %p1601_p7 }
  0x19   : > { %p1604_p10 = pneg %p1603_p9 }
  0x1b   : > { %p1609_p12 = pnand %p1607_p11, %p1604_p10 }
  0x1d   : > { %1612 = shalt.err (!%p1609_p12)
}
  0x1e   : > { %s1613_s30 = scalar_lea.vmem %s1953_s20, 16  ;;  %s1620_s16 = scalar_lea.vmem %s1953_s20, 32 }
  0x1f   : > { %p1614_p13 = scmp.ne.s32.totalorder %s1953_s20, %s1613_s30  ;;  %p1621_p5 = scmp.lt.s32.totalorder %s1953_s20, %s1953_s20 }
  0x20   : > { %p1622_p7 = scmp.lt.s32.totalorder %s1620_s16, %s1613_s30 }
  0x21   : > { %p1616_p0 = pnand %p1614_p13, %p1981_p8 }
  0x22   : > { %p1623_p9 = por %p1622_p7, %p1621_p5 }
  0x23   : > { %p1617_p1 = pneg %p1616_p0 }
  0x25   : > { %p1624_p2 = pnand %p1623_p9, %p1617_p1 }
  0x27   : > { %1627 = shalt.err (!%p1624_p2)
}
  0x28   : > { %1495 = dma.hbm_to_vmem [thread:$0]  (!%p1965_p6), %s2305_s1, 16, %s1953_s20, [#allocation7]  }
  0x29   : > { %s1628_s28 = scalar_lea.hbm %s2309_s5, 16 }
  0x2a   : > { %p1629_p10 = scmp.ne.s32.totalorder %s2309_s5, %s1628_s28  ;;  %p1635_p2 = scmp.lt.u32.totalorder %s1628_s28, %s2309_s5 }
  0x2c   : > { %p1631_p11 = pnand %p1629_p10, %p1981_p8 }
  0x2e   : > { %p1632_p12 = pneg %p1631_p11 }
  0x30   : > { %p1637_p13 = pnand %p1635_p2, %p1632_p12 }
  0x32   : > { %1640 = shalt.err (!%p1637_p13)
}
  0x33   : > { %s1641_s20 = scalar_lea.vmem %s1961_s24, 16  ;;  %s1648_s14 = scalar_lea.vmem %s1961_s24, 32 }
  0x34   : > { %p1642_p0 = scmp.ne.s32.totalorder %s1961_s24, %s1641_s20  ;;  %p1649_p7 = scmp.lt.s32.totalorder %s1961_s24, %s1961_s24 }
  0x35   : > { %p1650_p9 = scmp.lt.s32.totalorder %s1648_s14, %s1641_s20 }
  0x36   : > { %p1644_p1 = pnand %p1642_p0, %p1981_p8 }
  0x37   : > { %p1651_p10 = por %p1650_p9, %p1649_p7 }
  0x38   : > { %p1645_p5 = pneg %p1644_p1 }
  0x3a   : > { %p1652_p11 = pnand %p1651_p10, %p1645_p5 }
  0x3c   : > { %1655 = shalt.err (!%p1652_p11)
}
  0x3d   : > { %1501 = dma.hbm_to_vmem [thread:$0]  (!%p1965_p6), %s2309_s5, 16, %s1961_s24, [#allocation10]  }
  0x3e   : > { %s2332_s0 = sld [smem:[#allocation21_spill]] }
  0x44   : > { %s1656_s23 = scalar_lea.hbm %s2332_s0, 128 }
  0x45   : > { %p1657_p12 = scmp.ne.s32.totalorder %s2332_s0, %s1656_s23  ;;  %p1663_p0 = scmp.lt.u32.totalorder %s1656_s23, %s2332_s0 }
  0x47   : > { %p1659_p2 = pnand %p1657_p12, %p1981_p8 }
  0x49   : > { %p1660_p13 = pneg %p1659_p2 }
  0x4b   : > { %p1665_p1 = pnand %p1663_p0, %p1660_p13 }
  0x4d   : > { %1668 = shalt.err (!%p1665_p1)
}
  0x4e   : > { %s1669_s24 = scalar_lea.vmem %s1969_s26, 128  ;;  %p1677_p10 = scmp.lt.s32.totalorder %s1969_s26, %s1969_s26 }
  0x4f   : > { %p1670_p5 = scmp.ne.s32.totalorder %s1969_s26, %s1669_s24  ;;  %p1678_p11 = scmp.lt.s32.totalorder %s1669_s24, %s1669_s24 }
  0x51   : > { %p1672_p7 = pnand %p1670_p5, %p1981_p8  ;;  %p1679_p12 = por %p1678_p11, %p1677_p10 }
  0x53   : > { %p1673_p9 = pneg %p1672_p7 }
  0x55   : > { %p1680_p2 = pnand %p1679_p12, %p1673_p9 }
  0x57   : > { %1683 = shalt.err (!%p1680_p2)
}
  0x58   : > { %1492 = dma.hbm_to_vmem [thread:$0]  (!%p1965_p6), %s2332_s0, 128, %s1969_s26, [#allocation4]  }
  0x59   : > { %s1684_s19 = scalar_lea.hbm %s2307_s3, 512 }
  0x5a   : > { %p1685_p13 = scmp.ne.s32.totalorder %s2307_s3, %s1684_s19  ;;  %p1691_p5 = scmp.lt.u32.totalorder %s1684_s19, %s2307_s3 }
  0x5c   : > { %p1687_p0 = pnand %p1685_p13, %p1981_p8 }
  0x5e   : > { %p1688_p1 = pneg %p1687_p0 }
  0x60   : > { %p1693_p7 = pnand %p1691_p5, %p1688_p1 }
  0x62   : > { %1696 = shalt.err (!%p1693_p7)
}
  0x63   : > { %s1697_s26 = scalar_lea.vmem %s1971_s29, 512  ;;  %p1705_p12 = scmp.lt.s32.totalorder %s1971_s29, %s1971_s29 }
  0x64   : > { %p1698_p9 = scmp.ne.s32.totalorder %s1971_s29, %s1697_s26  ;;  %p1706_p2 = scmp.lt.s32.totalorder %s1697_s26, %s1697_s26 }
  0x66   : > { %p1700_p10 = pnand %p1698_p9, %p1981_p8  ;;  %p1707_p13 = por %p1706_p2, %p1705_p12 }
  0x68   : > { %p1701_p11 = pneg %p1700_p10 }
  0x6a   : > { %p1708_p0 = pnand %p1707_p13, %p1701_p11 }
  0x6c   : > { %1711 = shalt.err (!%p1708_p0)
}
  0x6d   : > { %s1850_s20 = smov 128   ;;  %s1851_s24 = smov 8  }
  0x6e   : > { %1498 = dma.hbm_to_vmem [thread:$0]  (!%p1965_p6), %s2307_s3, 512, %s1971_s29, [#allocation7], %s1850_s20, %s1850_s20, %s1851_s24  }
  0x6f   : > { %s1852_s13 = smov [#allocation11]   ;;  %s1712_s28 = scalar_lea.hbm %s2312_s8, 768 }
  0x70   : > { %s442_s17 = sshll.u32 %s1852_s13, 4  ;;  %p1713_p1 = scmp.ne.s32.totalorder %s2312_s8, %s1712_s28  ;;  %s443_s17 = int_to_ptr.vmem [resolvable:$true] %s442_s17 }
  0x71   : > { %p1719_p9 = scmp.lt.u32.totalorder %s1712_s28, %s2312_s8 }
  0x72   : > { %p1715_p5 = pnand %p1713_p1, %p1981_p8 }
  0x74   : > { %p1716_p7 = pneg %p1715_p5 }
  0x76   : > { %p1721_p10 = pnand %p1719_p9, %p1716_p7 }
  0x78   : > { %1724 = shalt.err (!%p1721_p10)
}
  0x79   : > { %s1725_s29 = scalar_lea.vmem %s443_s17, 768  ;;  %p1733_p13 = scmp.lt.s32.totalorder %s443_s17, %s443_s17 }
  0x7a   : > { %p1726_p11 = scmp.ne.s32.totalorder %s443_s17, %s1725_s29  ;;  %p1734_p0 = scmp.lt.s32.totalorder %s1725_s29, %s1725_s29 }
  0x7c   : > { %p1728_p12 = pnand %p1726_p11, %p1981_p8  ;;  %p1735_p3 = por %p1734_p0, %p1733_p13 }
  0x7e   : > { %p1729_p2 = pneg %p1728_p12 }
  0x80   : > { %p1736_p4 = pnand %p1735_p3, %p1729_p2 }
  0x82   : > { %1739 = shalt.err (!%p1736_p4)
}
  0x83   : > { %s1853_s20 = smov 192   ;;  %s1854_s24 = smov 12  }
  0x84   : > { %1504 = dma.hbm_to_vmem [thread:$0]  (!%p1965_p6), %s2312_s8, 768, %s443_s17, [#allocation10], %s1853_s20, %s1853_s20, %s1854_s24  }
  0x85   : > { %p2333_p1 = scmp.ne.s32.totalorder %s2329_s22, 0 }
  0x86   : > { %p2334_p5 = scmp.eq.s32.totalorder (!%p2333_p1), %s1947_s21, 0 }
  0x87   : > { %470 = sbr.rel (%p2333_p1) target bundleno = 1950 (0x79e), region = 72 }
  0x8e   : > { %1823 = dma.done.wait (%p2334_p5), [#allocation4], 128   ;;  %p2335_p8 = pmov %p2334_p5 }
  0x8f   : > { %p2336_p3 = pmov %p2334_p5 }
  0x90   : > { %1825 = vsyncadd (%p2335_p8), [#allocation4], 4294967168 }
  0x91   : > { %1827 = dma.done.wait (%p2336_p3), [#allocation7], 528   ;;  %p2337_p4 = pmov %p2336_p3 }
  0x92   : > { %p2338_p7 = pmov %p2336_p3 }
  0x93   : > { %1829 = vsyncadd (%p2337_p4), [#allocation7], 4294966768 }
  0x94   : > { %1831 = dma.done.wait (%p2338_p7), [#allocation10], 784   ;;  %p2339_p6 = pmov %p2336_p3 }
  0x95   : > { %p2340_p9 = scmp.ne.s32.totalorder %s1947_s21, 0 }
  0x96   : > { %1833 = vsyncadd (%p2339_p6), [#allocation10], 4294966512  ;;  %v529_v0 = vld [vmem:[#allocation6] sm:$0x1] (!%p2340_p9)  ;;  %vm530_vm0 = vcmask (!%p2340_p9), 253952  }
  0x97   : > { %528 = sbr.rel (%p2340_p9) target bundleno = 158 (0x9e), region = 96  ;;  %531 = vst.msk [vmem:[#allocation2] sm:$0x1] (!%p2340_p9), %vm530_vm0, %v529_v0 }
  0x9e PF: > { %v1544_v1 = vld [vmem:[#allocation8 + $0x4] ss:$8 sps:$4 sm:$0xff]   ;;  %v1855_v3 = vmov 0   ;;  %v1548_v4 = vld [vmem:[#allocation8] ss:$8 sps:$4 sm:$0xff]   ;;  %vm561_vm1 = vcmask 261120  }
  0x9f   : > { %v1546_v2 = vld [vmem:[%s2308_s4 + $0x4] ss:$16 sps:$4 sm:$0xff]   ;;  %597 = vmatprep.mubr.bf16.mxu0 %v1855_v3  ;;  %689 = vmatprep.mubr.bf16.mxu1 %v1855_v3  ;;  %v1549_v5 = vld [vmem:[%s2308_s4] ss:$16 sps:$4 sm:$0xff]   ;;  %s1383_s28 = scalar_lea.vmem [#allocation3], %s1844_s18  ;;  %vm742_vm2 = vcmask 1040384  }
  0xa0   : > { %565 = vmatprep.subr.bf16.mxu0 %v1544_v1  ;;  %657 = vmatprep.subr.bf16.mxu1 %v1546_v2  ;;  %v1550_v6 = vld [vmem:[#allocation8 + $0x14] ss:$8 sps:$4 sm:$0xff]   ;;  %v1554_v8 = vld [vmem:[#allocation8 + $0x10] ss:$8 sps:$4 sm:$0xff]   ;;  %v740_v16 = vld [vmem:[#allocation9] sm:$0x1] }
  0xa1   : > { %566 = vmatpush1.bf16.msra.mxu0 %v1548_v4  ;;  %658 = vmatpush1.bf16.msra.mxu1 %v1549_v5  ;;  %v1552_v7 = vld [vmem:[%s2308_s4 + $0x24] ss:$16 sps:$4 sm:$0xff]   ;;  %v1555_v9 = vld [vmem:[%s2308_s4 + $0x20] ss:$16 sps:$4 sm:$0xff]   ;;  %v1385_v10 = vld [vmem:[%s1383_s28 - $0x1] sm:$0x1] }
  0xa2   : > { %567 = vmatprep.subr.bf16.mxu0 %v1550_v6  ;;  %v2122_v11 = vld [vmem:[#allocation2] sm:$0x1]  ;;  %659 = vmatprep.subr.bf16.mxu1 %v1552_v7  ;;  %v535_v12 = vpack.c.bf16 %v1385_v10, %v1385_v10  ;;  %v1856_v27 = vmov 0.0   ;;  %v1557_v28 = vld [vmem:[%s2306_s2 + $0x8] sm:$0xff]   ;;  %v1558_v29 = vld [vmem:[%s2306_s2 + $0x10] sm:$0xff]   ;;  %vm1857_vm3 = vmmov 0  }
  0xa3   : > { %v2126_v13 = vpack.c.bf16 %v2122_v11, %v2122_v11  ;;  %v1556_v26 = vld [vmem:[%s2306_s2] sm:$0xff]   ;;  %v1559_v30 = vld [vmem:[%s2306_s2 + $0x18] sm:$0xff]   ;;  %v1561_v37 = vld [vmem:[%s2306_s2 + $0x28] sm:$0xff]   ;;  %s1386_s15 = scalar_lea.vmem [#allocation15], %s1844_s18  ;;  %vm1108_vm4 = vcmask 253952   ;;  %s1389_s24 = scalar_lea.vmem [#allocation13], %s1844_s18 }
  0xa4   : > { %v1560_v36 = vld [vmem:[%s2306_s2 + $0x20] sm:$0xff]   ;;  %v1562_v38 = vld [vmem:[%s2306_s2 + $0x30] sm:$0xff]   ;;  %v1563_v39 = vld [vmem:[%s2306_s2 + $0x38] sm:$0xff]   ;;  %p1515_p10 = scmp.eq.s32.totalorder %s1947_s21, 7  ;;  %s1858_s22 = smov [#allocation13]  }
  0xa5   : > { %568 = vmatpush1.bf16.msra.mxu0 %v1554_v8  ;;  %660 = vmatpush1.bf16.msra.mxu1 %v1555_v9  ;;  %v1564_v40 = vld [vmem:[%s2308_s4 + $0x8] ss:$16 sps:$4 sm:$0xff]   ;;  %v1566_v41 = vld [vmem:[%s2308_s4 + $0xc] ss:$16 sps:$4 sm:$0xff]   ;;  %v1570_v44 = vld [vmem:[%s2310_s6] sm:$0xff]   ;;  %s1205_s27 = sshll.u32 %s1858_s22, 4  ;;  %s1206_s27 = int_to_ptr.vmem [resolvable:$true] %s1205_s27 }
  0xa6   : > { %1413 = vmatprep.subr.bf16.mxu1 %v1856_v27  ;;  %v1569_v42 = vld [vmem:[%s2308_s4 + $0x2c] ss:$16 sps:$4 sm:$0xff]   ;;  %698 = vmatprep.subr.bf16.mxu0 %v1566_v41  ;;  %v1567_v43 = vld [vmem:[%s2308_s4 + $0x28] ss:$16 sps:$4 sm:$0xff]   ;;  %v922_v0 = vld [vmem:[%s2311_s7] sm:$0x1]  ;;  %p1747_p13 = scmp.lt.s32.totalorder %s1206_s27, %s1206_s27 }
  0xa7   : > { %v1571_v45 = vld [vmem:[%s2310_s6 + $0x8] sm:$0xff]   ;;  %v1574_v59 = vld [vmem:[#allocation11 + $0x4] ss:$12 sps:$4 sm:$0xff]   ;;  %v1578_v7 = vld [vmem:[#allocation11 + $0x8] ss:$12 sps:$4 sm:$0xff]   ;;  %s1740_s25 = scalar_lea.vmem %s1206_s27, 128 }
  0xa8   : > { %1337 = vmatmul.mubr.msk.bf16.vlgmr.msra.gmra.mrb[0].mxu0 %vm561_vm1, %v535_v12  ;;  %1346 = vmatmul.mubr.msk.bf16.vlgmr.msra.gmra.mrb[0].mxu1 %vm561_vm1, %v2126_v13  ;;  %v1572_v60 = vld [vmem:[#allocation11] ss:$12 sps:$4 sm:$0xff]   ;;  %v1577_v61 = vld [vmem:[#allocation11 + $0x1c] ss:$12 sps:$4 sm:$0xff]   ;;  %v1575_v62 = vld [vmem:[#allocation11 + $0x18] ss:$12 sps:$4 sm:$0xff]   ;;  %p1741_p11 = scmp.ne.s32.totalorder %s1206_s27, %s1740_s25  ;;  %p1748_p0 = scmp.lt.s32.totalorder %s1740_s25, %s1740_s25 }
  0xa9   : > { %730 = vmatprep.mubr.bf16.mxu0 %v1855_v3  ;;  %1414 = vmatpush3.bf16.msra.mxu1 %v1556_v26  ;;  %v1579_v9 = vld [vmem:[#allocation11 + $0x20] ss:$12 sps:$4 sm:$0xff]   ;;  %v1580_v10 = vld [vmem:[%s2315_s11] sm:$0xff]  }
  0xaa   : > { %1415 = vmatprep.subr.bf16.mxu1 %v1856_v27  ;;  %1429 = vmatprep.mubr.msk.bf16.mxu1 %vm1857_vm3, %v1856_v27  ;;  %v1581_v12 = vld [vmem:[%s2315_s11 + $0x8] sm:$0xff]   ;;  %p1742_p12 = pnand %p1741_p11, %p1515_p10  ;;  %p1749_p1 = por %p1748_p0, %p1747_p13 }
  0xab   : > { %699 = vmatpush1.bf16.msra.mxu0 %v1564_v40 }
  0xac   : > { %700 = vmatprep.subr.bf16.mxu0 %v1569_v42  ;;  %p1743_p2 = pneg %p1742_p12 }
  0xad   : > { %1416 = vmatpush3.bf16.msra.mxu1 %v1557_v28 }
  0xae   : > { %1417 = vmatprep.subr.bf16.mxu1 %v1856_v27  ;;  %p1750_p5 = pnand %p1749_p1, %p1743_p2 }
  0xaf   : > { %701 = vmatpush1.bf16.msra.mxu0 %v1567_v43 }
  0xb0   : > { %1433 = vmatprep.subr.bf16.mxu0 %v1856_v27 }
  0xb1   : > { %1418 = vmatpush3.bf16.msra.mxu1 %v1558_v29 }
  0xb2   : > { %1419 = vmatprep.subr.bf16.mxu1 %v1856_v27  ;;  %1347 = vmatmul.mubr.msk.bf16.vlgmr.msra.gmra.mrb[4].mxu0 %vm561_vm1, %v2126_v13  ;;  %v968_v13 = vlaneseq }
  0xb3   : > { %1434 = vmatpush3.bf16.msra.mxu0 %v1570_v44  ;;  %1437 = vmatprep.mubr.msk.bf16.mxu0 %vm1857_vm3, %v1856_v27 }
  0xb4   : > { %1435 = vmatprep.subr.bf16.mxu0 %v1856_v27 }
  0xb5   : > { %1420 = vmatpush3.bf16.msra.mxu1 %v1559_v30 }
  0xb6   : > { %1421 = vmatprep.subr.bf16.mxu1 %v1856_v27 }
  0xb7   : > { %1436 = vmatpush3.bf16.msra.mxu0 %v1571_v45 }
  0xb8   : > { %986 = vmatprep.subr.bf16.mxu0 %v1574_v59 }
  0xb9   : > { %1422 = vmatpush3.bf16.msra.mxu1 %v1560_v36 }
  0xba   : > { %1423 = vmatprep.subr.bf16.mxu1 %v1856_v27 }
  0xbd   : > { %1424 = vmatpush3.bf16.msra.mxu1 %v1561_v37 }
  0xbe   : > { %1425 = vmatprep.subr.bf16.mxu1 %v1856_v27 }
  0xc1   : > { %1426 = vmatpush3.bf16.msra.mxu1 %v1562_v38 }
  0xc2   : > { %1427 = vmatprep.subr.bf16.mxu1 %v1856_v27 }
  0xc5   : > { %1428 = vmatpush3.bf16.msra.mxu1 %v1563_v39 }
 0x17b   : > { %v599_v14 = vpop.f32.mrb[0].mxu0  ;;  %v691_v15 = vpop.f32.mrb[0].mxu1 }
 0x17c   : > { %v739_v17 = vadd.f32 %v691_v15, %v599_v14  ;;  %v2132_v18 = vpop.f32.mrb[1].mxu0  ;;  %v2134_v19 = vpop.f32.mrb[1].mxu1  ;;  %v969_v14 = vshrl.u32 %v968_v13, 7 }
 0x17d   : > { %v603_v20 = vpop.f32.mrb[2].mxu0  ;;  %v695_v21 = vpop.f32.mrb[2].mxu1 }
 0x17e   : > { %v604_v22 = vpop.f32.mrb[3].mxu0  ;;  %v696_v23 = vpop.f32.mrb[3].mxu1  ;;  %v741_v24 = vadd.f32 %v740_v16, %v739_v17  ;;  %v970_v15 = vsub.s32 0, %v969_v14  ;;  %v1067_v16 = vld [vmem:[%s2314_s10] sm:$0x7]  ;;  %v974_v17 = vsub.s32 1, %v969_v14 }
 0x180   : > { %v743_v25 = vsel %vm742_vm2, %v741_v24, -inf  ;;  %v1072_v20 = vrot.slane %v1067_v16, %v970_v15  ;;  %v1076_v22 = vrot.slane %v1067_v16, %v974_v17 }
 0x181   : > { %744 = vmax.xlane.f32.xlu0 %v743_v25 }
 0x182   : > { %v1084_v25 = vadd.f32 %v1072_v20, %v2134_v19  ;;  %v978_v19 = vsub.s32 2, %v969_v14 }
 0x184   : > { %v1080_v43 = vrot.slane %v1067_v16, %v978_v19 }
 0x185   : > { %v732_v50 = vpop.f32.mrb[4].mxu0 }
 0x186   : > { %v2197_v51 = vpop.f32.mrb[5].mxu0  ;;  %v1085_v28 = vadd.f32 %v1076_v22, %v732_v50 }
 0x187   : > { %v736_v52 = vpop.f32.mrb[6].mxu0 }
 0x188   : > { %v737_v53 = vpop.f32.mrb[7].mxu0 }
 0x20e   : > { %v745_v31 = vpop.xlane.xlu0 %744 }
 0x20f   : > { %v746_v32 = vsub.f32 %v741_v24, %v745_v31 }
 0x211   : > { %v747_v33 = vmul.f32 1.442695, %v746_v32 }
 0x213   : > { %1582 = vpow2.f32 %v747_v33 }
 0x21d   : > { %v1583_v34 = vpop.eup %1582 }
 0x21e   : > { %v749_v35 = vsel %vm742_vm2, %v1583_v34, 0.0 }
 0x21f   : > { %750 = vadd.xlane.f32.xlu0 %v749_v35 }
 0x2ac   : > { %v751_v46 = vpop.xlane.xlu0 %750 }
 0x2ad   : > { %1584 = vrcp.f32 %v751_v46  ;;  %v1086_v46 = vadd.f32 %v1080_v43, %v2197_v51  ;;  %v1117_v51 = vld [vmem:[%s2316_s12] sm:$0x1] }
 0x2b7   : > { %v1585_v47 = vpop.eup %1584 }
 0x2b8   : > { %v753_v48 = vmul.f32 %v1585_v47, %v1583_v34 }
 0x2ba   : > { %v756_v49 = vpack.c.bf16 %v753_v48, %v753_v48  ;;  %1388 = vst [vmem:[%s1386_s15 - $0x1] sm:$0x1] %v753_v48 }
 0x2bc   : > { %1430 = vmatmul.mubr.bf16.vlgmr.msra.gmra.mrb[4].mxu1 %v756_v49 }
 0x38f   : > { %v855_v54 = vpop.f32.mrb[4].mxu1 }
 0x390   : > { %v861_v55 = vpack.c.bf16 %v855_v54, %v855_v54  ;;  %v1431_v56 = vpop.f32.mrb[5].mxu1 }
 0x391   : > { %v858_v57 = vpop.f32.mrb[6].mxu1 }
 0x392   : > { %v1432_v58 = vpop.f32.mrb[7].mxu1  ;;  %1438 = vmatmul.mubr.msk.bf16.vlgmr.msra.gmra.mrb[8].mxu0 %vm561_vm1, %v861_v55 }
 0x393   : > { %1018 = vmatprep.mubr.bf16.mxu0 %v1855_v3  ;;  %987 = vmatpush1.bf16.msra.mxu0 %v1572_v60 }
 0x394   : > { %988 = vmatprep.subr.bf16.mxu0 %v1577_v61 }
 0x397   : > { %989 = vmatpush1.bf16.msra.mxu0 %v1575_v62 }
 0x398   : > { %1441 = vmatprep.subr.bf16.mxu0 %v1856_v27 }
 0x465   : > { %v915_v63 = vpop.f32.mrb[8].mxu0 }
 0x466   : > { %v921_v1 = vadd.f32 %v915_v63, %v2132_v18  ;;  %v1439_v2 = vpop.f32.mrb[9].mxu0  ;;  %v934_v18 = vld [vmem:[%s2313_s9] sm:$0x7] }
 0x467   : > { %v918_v4 = vpop.f32.mrb[10].mxu0  ;;  %v971_v21 = vrot.slane %v934_v18, %v970_v15  ;;  %v975_v23 = vrot.slane %v934_v18, %v974_v17  ;;  %v979_v45 = vrot.slane %v934_v18, %v978_v19 }
 0x468   : > { %v923_v3 = vadd.f32 %v922_v0, %v921_v1  ;;  %v1440_v5 = vpop.f32.mrb[11].mxu0 }
 0x46a   : > { %v924_v6 = vmax.f32 %v923_v3, 0.0 }
 0x46c   : > { %v925_v8 = vpack.c.bf16 %v924_v6, %v924_v6 }
 0x46e   : > { %1366 = vmatmul.mubr.msk.bf16.vlgmr.msra.gmra.mrb[12].mxu0 %vm561_vm1, %v925_v8 }
 0x46f   : > { %1442 = vmatpush3.bf16.msra.mxu0 %v1578_v7  ;;  %1445 = vmatprep.mubr.msk.bf16.mxu0 %vm1857_vm3, %v1856_v27 }
 0x470   : > { %1443 = vmatprep.subr.bf16.mxu0 %v1856_v27 }
 0x473   : > { %1444 = vmatpush3.bf16.msra.mxu0 %v1579_v9 }
 0x474   : > { %1449 = vmatprep.subr.bf16.mxu0 %v1856_v27 }
 0x476   : > { %1446 = vmatmul.mubr.msk.bf16.vlgmr.msra.gmra.mrb[16].mxu0 %vm561_vm1, %v925_v8 }
 0x477   : > { %1453 = vmatprep.mubr.msk.bf16.mxu0 %vm1857_vm3, %v1856_v27  ;;  %1450 = vmatpush3.bf16.msra.mxu0 %v1580_v10 }
 0x478   : > { %1451 = vmatprep.subr.bf16.mxu0 %v1856_v27 }
 0x47b   : > { %1452 = vmatpush3.bf16.msra.mxu0 %v1581_v12 }
 0x541   : > { %v1020_v24 = vpop.f32.mrb[12].mxu0 }
 0x542   : > { %v1021_v26 = vadd.f32 %v1020_v24, %v971_v21  ;;  %v1022_v27 = vpop.f32.mrb[13].mxu0 }
 0x543   : > { %v1023_v29 = vadd.f32 %v1022_v27, %v975_v23  ;;  %v1024_v30 = vpop.f32.mrb[14].mxu0 }
 0x544   : > { %v1087_v31 = vadd.f32 %v1084_v25, %v1021_v26  ;;  %v1025_v32 = vpop.f32.mrb[15].mxu0 }
 0x545   : > { %v1094_v33 = vadd.f32 %v1085_v28, %v1023_v29 }
 0x546   : > { %v1368_v34 = vmul.f32 -1.442695, %v1087_v31 }
 0x547   : > { %v1369_v37 = vmul.f32 -1.442695, %v1094_v33 }
 0x548   : > { %1586 = vpow2.f32 %v1368_v34 }
 0x549   : > { %v1061_v35 = vpop.f32.mrb[16].mxu0  ;;  %1588 = vpow2.f32 %v1369_v37 }
 0x54a   : > { %v1447_v36 = vpop.f32.mrb[17].mxu0  ;;  %v1062_v48 = vadd.f32 %v1061_v35, %v979_v45 }
 0x54b   : > { %v1064_v38 = vpop.f32.mrb[18].mxu0 }
 0x54c   : > { %v1448_v39 = vpop.f32.mrb[19].mxu0 }
 0x552   : > { %v1587_v40 = vpop.eup %1586 }
 0x553   : > { %v1091_v41 = vadd.f32 1.0, %v1587_v40  ;;  %v1589_v42 = vpop.eup %1588 }
 0x554   : > { %v1098_v44 = vadd.f32 1.0, %v1589_v42 }
 0x555   : > { %1590 = vrcp.f32 %v1091_v41 }
 0x556   : > { %1592 = vrcp.f32 %v1098_v44 }
 0x55f   : > { %v1591_v47 = vpop.eup %1590 }
 0x560   : > { %v1101_v49 = vmul.f32 %v1591_v47, %v1086_v46  ;;  %v1593_v52 = vpop.eup %1592 }
 0x561   : > { %v1104_v53 = vsub.f32 1.0, %v1593_v52  ;;  %v1106_v55 = vmul.f32 %v1593_v52, %v2122_v11 }
 0x562   : > { %v1102_v50 = vadd.f32 %v1101_v49, %v1062_v48 }
 0x564   : > { %1594 = vtanh.f32 %v1102_v50 }
 0x56e   : > { %v1595_v54 = vpop.eup %1594 }
 0x56f   : > { %v1105_v56 = vmul.f32 %v1595_v54, %v1104_v53 }
 0x571   : > { %v1107_v57 = vadd.f32 %v1106_v55, %v1105_v56 }
 0x573   : > { %v1112_v58 = vpack.c.bf16 %v1107_v57, %v1107_v57  ;;  %1109 = vst.msk [vmem:[#allocation2] sm:$0x1] %vm1108_vm4, %v1107_v57  ;;  %1391 = vst.msk [vmem:[%s1389_s24 - $0x1] sm:$0x1] %vm1108_vm4, %v1107_v57 }
 0x575   : > { %1454 = vmatmul.mubr.msk.bf16.vlgmr.msra.gmra.mrb[20].mxu0 %vm561_vm1, %v1112_v58 }
 0x648   : > { %v1167_v59 = vpop.f32.mrb[20].mxu0 }
 0x649   : > { %v1168_v60 = vadd.f32 %v1167_v59, %v1117_v51  ;;  %v1455_v61 = vpop.f32.mrb[21].mxu0 }
 0x64a   : > { %v1170_v62 = vpop.f32.mrb[22].mxu0 }
 0x64b   : > { %v1456_v63 = vpop.f32.mrb[23].mxu0  ;;  %v1173_v11 = vsel %vm742_vm2, %v1168_v60, -inf }
 0x64c   : > { %1174 = vmax.xlane.f32.xlu1 %v1173_v11 }
 0x6d9   : > { %v1175_v0 = vpop.xlane.xlu1 %1174 }
 0x6da   : > { %v1176_v1 = vsub.f32 %v1168_v60, %v1175_v0 }
 0x6dc   : > { %v1177_v2 = vmul.f32 1.442695, %v1176_v1 }
 0x6de   : > { %1596 = vpow2.f32 %v1177_v2 }
 0x6e8   : > { %v1597_v4 = vpop.eup %1596 }
 0x6e9   : > { %v1179_v3 = vsel %vm742_vm2, %v1597_v4, 0.0 }
 0x6ea   : > { %1180 = vadd.xlane.f32.xlu1 %v1179_v3 }
 0x6eb   : > { %1753 = shalt.err (!%p1750_p5)
}
 0x6ec   : > { %s2341_s17 = sld [smem:[#allocation23_spill]] }
 0x6f2   : > { %s1754_s19 = scalar_lea.hbm %s2341_s17, 128 }
 0x6f3   : > { %p1755_p8 = scmp.ne.s32.totalorder %s2341_s17, %s1754_s19  ;;  %p1760_p7 = scmp.lt.u32.totalorder %s1754_s19, %s2341_s17 }
 0x6f5   : > { %p1756_p3 = pnand %p1755_p8, %p1515_p10 }
 0x6f7   : > { %p1757_p4 = pneg %p1756_p3 }
 0x6f9   : > { %p1762_p6 = pnand %p1760_p7, %p1757_p4 }
 0x6fb   : > { %1765 = shalt.err (!%p1762_p6)
}
 0x6fc   : > { %1480 = dma.vmem_to_hbm [thread:$0]  (%p1515_p10), %s1206_s27, 128, %s2341_s17, [#allocation14]  }
 0x6fd   : > { %s1859_s20 = smov [#allocation15]  }
 0x6fe   : > { %s1216_s24 = sshll.u32 %s1859_s20, 4  ;;  %s1217_s24 = int_to_ptr.vmem [resolvable:$true] %s1216_s24 }
 0x6ff   : > { %s1766_s14 = scalar_lea.vmem %s1217_s24, 128  ;;  %p1773_p2 = scmp.lt.s32.totalorder %s1217_s24, %s1217_s24 }
 0x700   : > { %p1767_p9 = scmp.ne.s32.totalorder %s1217_s24, %s1766_s14  ;;  %p1774_p13 = scmp.lt.s32.totalorder %s1766_s14, %s1766_s14 }
 0x702   : > { %p1768_p11 = pnand %p1767_p9, %p1515_p10  ;;  %p1775_p0 = por %p1774_p13, %p1773_p2 }
 0x704   : > { %p1769_p12 = pneg %p1768_p11 }
 0x706   : > { %p1776_p1 = pnand %p1775_p0, %p1769_p12 }
 0x708   : > { %1779 = shalt.err (!%p1776_p1)
}
 0x709   : > { %s2342_s25 = sld [smem:[#allocation24_spill]] }
 0x70f   : > { %s1780_s15 = scalar_lea.hbm %s2342_s25, 128 }
 0x710   : > { %p1781_p5 = scmp.ne.s32.totalorder %s2342_s25, %s1780_s15  ;;  %p1786_p4 = scmp.lt.u32.totalorder %s1780_s15, %s2342_s25 }
 0x712   : > { %p1782_p8 = pnand %p1781_p5, %p1515_p10 }
 0x714   : > { %p1783_p3 = pneg %p1782_p8 }
 0x716   : > { %p1788_p7 = pnand %p1786_p4, %p1783_p3 }
 0x718   : > { %1791 = shalt.err (!%p1788_p7)
}
 0x719   : > { %1482 = dma.vmem_to_hbm [thread:$0]  (%p1515_p10), %s1217_s24, 128, %s2342_s25, [#allocation14]  }
 0x71a   : > { %s1860_s16 = smov [#allocation12]   ;;  %s1392_s29 = scalar_lea.vmem [#allocation12], %s1844_s18 }
 0x71b   : > { %s1194_s26 = sshll.u32 %s1860_s16, 4  ;;  %s1195_s26 = int_to_ptr.vmem [resolvable:$true] %s1194_s26 }
 0x71c   : > { %s1792_s20 = scalar_lea.vmem %s1195_s26, 128  ;;  %p1799_p12 = scmp.lt.s32.totalorder %s1195_s26, %s1195_s26 }
 0x71d   : > { %p1793_p6 = scmp.ne.s32.totalorder %s1195_s26, %s1792_s20  ;;  %p1800_p2 = scmp.lt.s32.totalorder %s1792_s20, %s1792_s20 }
 0x71f   : > { %p1794_p9 = pnand %p1793_p6, %p1515_p10  ;;  %p1801_p13 = por %p1800_p2, %p1799_p12 }
 0x721   : > { %p1795_p11 = pneg %p1794_p9 }
 0x723   : > { %p1802_p0 = pnand %p1801_p13, %p1795_p11 }
 0x777   : > { %v1181_v5 = vpop.xlane.xlu1 %1180 }
 0x778   : > { %1598 = vlog2.f32 %v1181_v5 }
 0x782   : > { %v1599_v6 = vpop.eup %1598 }
 0x783   : > { %v1183_v7 = vmul.f32 0.6931472, %v1599_v6 }
 0x785   : > { %v1184_v8 = vsub.f32 %v1176_v1, %v1183_v7 }
 0x787   : > { %1394 = vst [vmem:[%s1392_s29 - $0x1] sm:$0x1] %v1184_v8 }
 0x788   : > { %1805 = shalt.err (!%p1802_p0)
}
 0x789   : > { %s2343_s0 = sld [smem:[#allocation22_spill]] }
 0x78f   : > { %s1806_s22 = scalar_lea.hbm %s2343_s0, 128 }
 0x790   : > { %p1807_p1 = scmp.ne.s32.totalorder %s2343_s0, %s1806_s22  ;;  %p1812_p3 = scmp.lt.u32.totalorder %s1806_s22, %s2343_s0 }
 0x792   : > { %p1808_p5 = pnand %p1807_p1, %p1515_p10 }
 0x794   : > { %p1809_p8 = pneg %p1808_p5 }
 0x796   : > { %p1814_p4 = pnand %p1812_p3, %p1809_p8 }
 0x798   : > { %1817 = shalt.err (!%p1814_p4)
}
 0x799   : > { %1478 = dma.vmem_to_hbm [thread:$0]  (%p1515_p10), %s1195_s26, 128, %s2343_s0, [#allocation5]  }
 0x79a   : > { %1835 = dma.done.wait (%p1515_p10), [#allocation5], 128  }
 0x79b   : > { %1837 = vsyncadd (%p1515_p10), [#allocation5], 4294967168 }
 0x79c   : > { %1839 = dma.done.wait (%p1515_p10), [#allocation14], 256  }
 0x79d   : > { %1841 = vsyncadd (%p1515_p10), [#allocation14], 4294967040 }
 0x79e PF: > { %s31_s18 = sadd.s32 1, %s1844_s18  }
 0x79f   : > { %p28_p7 = scmp.ge.s32.totalorder %s31_s18, 10  }
 0x7a1   :  { %30 = sbr.rel (!%p28_p7) target bundleno = 10 (0xa), region = 141 }
 0x7a8   :  { %1237 = vsyncpa [#allocation4], 1 }
 0x7a9   :  { %1239 = vsyncpa [#allocation4 + $0x1], 1 }
 0x7aa   :  { %1240 = vsyncpa [#allocation7], 1 }
 0x7ab   :  { %1241 = vsyncpa [#allocation10], 1 }
 0x7ac   :  { %1242 = vsyncpa [#allocation5], 1 }
 0x7ad   :  { %1244 = vsyncpa [#allocation5 + $0x1], 1 }
 0x7ae   :  { %1245 = vsyncpa [#allocation14], 1 }

// kernel: tpu_custom_call.1
= control target key start
LH: loop header
LB: loop body
LE: loop exit
PB: predicated region body
PF: predicated region fallthrough
CT: control target
= control target key end

     0   :  { %s2304_s0 = inlined_call_operand.hbm [shape: f32[8,32], index: 0, kind: input, shape index: {}]   ;;  %s2305_s1 = inlined_call_operand.hbm [shape: f32[1,32], index: 1, kind: input, shape index: {}]   ;;  %s2306_s2 = inlined_call_operand.vmem [shape: bf16[128,32], index: 2, kind: input, shape index: {}]   ;;  %s2307_s3 = inlined_call_operand.hbm [shape: bf16[32,160], index: 3, kind: input, shape index: {}]   ;;  %s2308_s4 = inlined_call_operand.vmem [shape: bf16[32,512], index: 4, kind: input, shape index: {}]   ;;  %s2309_s5 = inlined_call_operand.hbm [shape: f32[1,128], index: 5, kind: input, shape index: {}]   ;;  %s2310_s6 = inlined_call_operand.vmem [shape: bf16[32,32], index: 6, kind: input, shape index: {}]   ;;  %s2311_s7 = inlined_call_operand.vmem [shape: f32[1,32], index: 7, kind: input, shape index: {}]   ;;  %s2312_s8 = inlined_call_operand.hbm [shape: bf16[32,384], index: 8, kind: input, shape index: {}]   ;;  %s2313_s9 = inlined_call_operand.vmem [shape: f32[1,384], index: 9, kind: input, shape index: {}]   ;;  %s2314_s10 = inlined_call_operand.vmem [shape: f32[1,384], index: 10, kind: input, shape index: {}]   ;;  %s2315_s11 = inlined_call_operand.vmem [shape: bf16[32,128], index: 11, kind: input, shape index: {}]   ;;  %s2316_s12 = inlined_call_operand.vmem [shape: f32[1,128], index: 12, kind: input, shape index: {}]   ;;  %s2317_s13 = inlined_call_operand.hbm [shape: f32[8,128], index: 13, kind: output, shape index: {0}]   ;;  %s2318_s14 = inlined_call_operand.hbm [shape: f32[8,32], index: 14, kind: output, shape index: {1}]   ;;  %s2319_s15 = inlined_call_operand.hbm [shape: f32[8,128], index: 15, kind: output, shape index: {2}]  }
   0x1   :  { %2325 = sst [smem:[#allocation21_spill]] %s2304_s0 }
   0x2   :  { %2326 = sst [smem:[#allocation22_spill]] %s2317_s13 }
   0x3   :  { %2327 = sst [smem:[#allocation23_spill]] %s2318_s14 }
   0x4   :  { %2328 = sst [smem:[#allocation24_spill]] %s2319_s15 }
   0x5   :  { %21 = vsyncpa [#allocation4], 0 }
   0x6   :  { %22 = vsyncpa [#allocation7], 0 }
   0x7   :  { %23 = vsyncpa [#allocation10], 0 }
   0x8   :  { %24 = vsyncpa [#allocation5], 0 }
   0x9   :  { %25 = vsyncpa [#allocation14], 0  ;;  %s1941_s18 = smov 0  }
   0xa LB: > { %s1846_s19 = smov [#allocation6]   ;;  %s1947_s21 = sadd.s32 4294967295, %s1844_s18   ;;  %s1844_s18 = sphi %s1941_s18, %s31_s18  }
   0xb   : > { %s396_s20 = sshll.u32 %s1846_s19, 4  ;;  %p1319_p0 = scmp.ge.s32.totalorder %s1844_s18, 1  ;;  %s1953_s20 = int_to_ptr.vmem [resolvable:$true] %s396_s20 }
   0xc   : > { %p372_p1 = scmp.lt.s32.totalorder %s1844_s18, 9  ;;  %p2323_p3 = scmp.eq.s32.totalorder %s1947_s21, 0 }
   0xd   : > { %s1847_s23 = smov [#allocation9]   ;;  %s1848_s25 = smov [#allocation3]  }
   0xe   : > { %p1955_p4 = pnand %p1319_p0, %p372_p1  ;;  %s426_s24 = sshll.u32 %s1847_s23, 4  ;;  %s1961_s24 = int_to_ptr.vmem [resolvable:$true] %s426_s24 }
   0xf   : > { %s385_s26 = sshll.u32 %s1848_s25, 4  ;;  %s1849_s28 = smov [#allocation8]   ;;  %s1969_s26 = int_to_ptr.vmem [resolvable:$true] %s385_s26 }
  0x10   : > { %s2329_s22 = scalar_select %p1955_p4, 1, 0 }
  0x11   : > { %p1489_p5 = pneg %p1955_p4  ;;  %s409_s29 = sshll.u32 %s1849_s28, 4  ;;  %s1971_s29 = int_to_ptr.vmem [resolvable:$true] %s409_s29 }
  0x12   : > { %s1600_s17 = scalar_lea.hbm %s2305_s1, 16 }
  0x13   : > { %p1965_p6 = pnand %p2323_p3, %p1489_p5  ;;  %p1601_p7 = scmp.ne.s32.totalorder %s2305_s1, %s1600_s17 }
  0x14   : > { %p1607_p11 = scmp.lt.u32.totalorder %s1600_s17, %s2305_s1 }
  0x15   : > { %p1981_p8 = pneg %p1965_p6 }
  0x17   : > { %p1603_p9 = pnand %p1981_p8, %p1601_p7 }
  0x19   : > { %p1604_p10 = pneg %p1603_p9 }
  0x1b   : > { %p1609_p12 = pnand %p1607_p11, %p1604_p10 }
  0x1d   : > { %1612 = shalt.err (!%p1609_p12)
}
  0x1e   : > { %s1613_s30 = scalar_lea.vmem %s1953_s20, 16  ;;  %s1620_s16 = scalar_lea.vmem %s1953_s20, 32 }
  0x1f   : > { %p1614_p13 = scmp.ne.s32.totalorder %s1953_s20, %s1613_s30  ;;  %p1621_p5 = scmp.lt.s32.totalorder %s1953_s20, %s1953_s20 }
  0x20   : > { %p1622_p7 = scmp.lt.s32.totalorder %s1620_s16, %s1613_s30 }
  0x21   : > { %p1616_p0 = pnand %p1614_p13, %p1981_p8 }
  0x22   : > { %p1623_p9 = por %p1622_p7, %p1621_p5 }
  0x23   : > { %p1617_p1 = pneg %p1616_p0 }
  0x25   : > { %p1624_p2 = pnand %p1623_p9, %p1617_p1 }
  0x27   : > { %1627 = shalt.err (!%p1624_p2)
}
  0x28   : > { %1495 = dma.hbm_to_vmem [thread:$0]  (!%p1965_p6), %s2305_s1, 16, %s1953_s20, [#allocation7]  }
  0x29   : > { %s1628_s28 = scalar_lea.hbm %s2309_s5, 16 }
  0x2a   : > { %p1629_p10 = scmp.ne.s32.totalorder %s2309_s5, %s1628_s28  ;;  %p1635_p2 = scmp.lt.u32.totalorder %s1628_s28, %s2309_s5 }
  0x2c   : > { %p1631_p11 = pnand %p1629_p10, %p1981_p8 }
  0x2e   : > { %p1632_p12 = pneg %p1631_p11 }
  0x30   : > { %p1637_p13 = pnand %p1635_p2, %p1632_p12 }
  0x32   : > { %1640 = shalt.err (!%p1637_p13)
}
  0x33   : > { %s1641_s20 = scalar_lea.vmem %s1961_s24, 16  ;;  %s1648_s14 = scalar_lea.vmem %s1961_s24, 32 }
  0x34   : > { %p1642_p0 = scmp.ne.s32.totalorder %s1961_s24, %s1641_s20  ;;  %p1649_p7 = scmp.lt.s32.totalorder %s1961_s24, %s1961_s24 }
  0x35   : > { %p1650_p9 = scmp.lt.s32.totalorder %s1648_s14, %s1641_s20 }
  0x36   : > { %p1644_p1 = pnand %p1642_p0, %p1981_p8 }
  0x37   : > { %p1651_p10 = por %p1650_p9, %p1649_p7 }
  0x38   : > { %p1645_p5 = pneg %p1644_p1 }
  0x3a   : > { %p1652_p11 = pnand %p1651_p10, %p1645_p5 }
  0x3c   : > { %1655 = shalt.err (!%p1652_p11)
}
  0x3d   : > { %1501 = dma.hbm_to_vmem [thread:$0]  (!%p1965_p6), %s2309_s5, 16, %s1961_s24, [#allocation10]  }
  0x3e   : > { %s2332_s0 = sld [smem:[#allocation21_spill]] }
  0x44   : > { %s1656_s23 = scalar_lea.hbm %s2332_s0, 128 }
  0x45   : > { %p1657_p12 = scmp.ne.s32.totalorder %s2332_s0, %s1656_s23  ;;  %p1663_p0 = scmp.lt.u32.totalorder %s1656_s23, %s2332_s0 }
  0x47   : > { %p1659_p2 = pnand %p1657_p12, %p1981_p8 }
  0x49   : > { %p1660_p13 = pneg %p1659_p2 }
  0x4b   : > { %p1665_p1 = pnand %p1663_p0, %p1660_p13 }
  0x4d   : > { %1668 = shalt.err (!%p1665_p1)
}
  0x4e   : > { %s1669_s24 = scalar_lea.vmem %s1969_s26, 128  ;;  %p1677_p10 = scmp.lt.s32.totalorder %s1969_s26, %s1969_s26 }
  0x4f   : > { %p1670_p5 = scmp.ne.s32.totalorder %s1969_s26, %s1669_s24  ;;  %p1678_p11 = scmp.lt.s32.totalorder %s1669_s24, %s1669_s24 }
  0x51   : > { %p1672_p7 = pnand %p1670_p5, %p1981_p8  ;;  %p1679_p12 = por %p1678_p11, %p1677_p10 }
  0x53   : > { %p1673_p9 = pneg %p1672_p7 }
  0x55   : > { %p1680_p2 = pnand %p1679_p12, %p1673_p9 }
  0x57   : > { %1683 = shalt.err (!%p1680_p2)
}
  0x58   : > { %1492 = dma.hbm_to_vmem [thread:$0]  (!%p1965_p6), %s2332_s0, 128, %s1969_s26, [#allocation4]  }
  0x59   : > { %s1684_s19 = scalar_lea.hbm %s2307_s3, 512 }
  0x5a   : > { %p1685_p13 = scmp.ne.s32.totalorder %s2307_s3, %s1684_s19  ;;  %p1691_p5 = scmp.lt.u32.totalorder %s1684_s19, %s2307_s3 }
  0x5c   : > { %p1687_p0 = pnand %p1685_p13, %p1981_p8 }
  0x5e   : > { %p1688_p1 = pneg %p1687_p0 }
  0x60   : > { %p1693_p7 = pnand %p1691_p5, %p1688_p1 }
  0x62   : > { %1696 = shalt.err (!%p1693_p7)
}
  0x63   : > { %s1697_s26 = scalar_lea.vmem %s1971_s29, 512  ;;  %p1705_p12 = scmp.lt.s32.totalorder %s1971_s29, %s1971_s29 }
  0x64   : > { %p1698_p9 = scmp.ne.s32.totalorder %s1971_s29, %s1697_s26  ;;  %p1706_p2 = scmp.lt.s32.totalorder %s1697_s26, %s1697_s26 }
  0x66   : > { %p1700_p10 = pnand %p1698_p9, %p1981_p8  ;;  %p1707_p13 = por %p1706_p2, %p1705_p12 }
  0x68   : > { %p1701_p11 = pneg %p1700_p10 }
  0x6a   : > { %p1708_p0 = pnand %p1707_p13, %p1701_p11 }
  0x6c   : > { %1711 = shalt.err (!%p1708_p0)
}
  0x6d   : > { %s1850_s20 = smov 128   ;;  %s1851_s24 = smov 8  }
  0x6e   : > { %1498 = dma.hbm_to_vmem [thread:$0]  (!%p1965_p6), %s2307_s3, 512, %s1971_s29, [#allocation7], %s1850_s20, %s1850_s20, %s1851_s24  }
  0x6f   : > { %s1852_s13 = smov [#allocation11]   ;;  %s1712_s28 = scalar_lea.hbm %s2312_s8, 768 }
  0x70   : > { %s442_s17 = sshll.u32 %s1852_s13, 4  ;;  %p1713_p1 = scmp.ne.s32.totalorder %s2312_s8, %s1712_s28  ;;  %s443_s17 = int_to_ptr.vmem [resolvable:$true] %s442_s17 }
  0x71   : > { %p1719_p9 = scmp.lt.u32.totalorder %s1712_s28, %s2312_s8 }
  0x72   : > { %p1715_p5 = pnand %p1713_p1, %p1981_p8 }
  0x74   : > { %p1716_p7 = pneg %p1715_p5 }
  0x76   : > { %p1721_p10 = pnand %p1719_p9, %p1716_p7 }
  0x78   : > { %1724 = shalt.err (!%p1721_p10)
}
  0x79   : > { %s1725_s29 = scalar_lea.vmem %s443_s17, 768  ;;  %p1733_p13 = scmp.lt.s32.totalorder %s443_s17, %s443_s17 }
  0x7a   : > { %p1726_p11 = scmp.ne.s32.totalorder %s443_s17, %s1725_s29  ;;  %p1734_p0 = scmp.lt.s32.totalorder %s1725_s29, %s1725_s29 }
  0x7c   : > { %p1728_p12 = pnand %p1726_p11, %p1981_p8  ;;  %p1735_p3 = por %p1734_p0, %p1733_p13 }
  0x7e   : > { %p1729_p2 = pneg %p1728_p12 }
  0x80   : > { %p1736_p4 = pnand %p1735_p3, %p1729_p2 }
  0x82   : > { %1739 = shalt.err (!%p1736_p4)
}
  0x83   : > { %s1853_s20 = smov 192   ;;  %s1854_s24 = smov 12  }
  0x84   : > { %1504 = dma.hbm_to_vmem [thread:$0]  (!%p1965_p6), %s2312_s8, 768, %s443_s17, [#allocation10], %s1853_s20, %s1853_s20, %s1854_s24  }
  0x85   : > { %p2333_p1 = scmp.ne.s32.totalorder %s2329_s22, 0 }
  0x86   : > { %p2334_p5 = scmp.eq.s32.totalorder (!%p2333_p1), %s1947_s21, 0 }
  0x87   : > { %470 = sbr.rel (%p2333_p1) target bundleno = 1950 (0x79e), region = 72 }
  0x8e   : > { %1823 = dma.done.wait (%p2334_p5), [#allocation4], 128   ;;  %p2335_p8 = pmov %p2334_p5 }
  0x8f   : > { %p2336_p3 = pmov %p2334_p5 }
  0x90   : > { %1825 = vsyncadd (%p2335_p8), [#allocation4], 4294967168 }
  0x91   : > { %1827 = dma.done.wait (%p2336_p3), [#allocation7], 528   ;;  %p2337_p4 = pmov %p2336_p3 }
  0x92   : > { %p2338_p7 = pmov %p2336_p3 }
  0x93   : > { %1829 = vsyncadd (%p2337_p4), [#allocation7], 4294966768 }
  0x94   : > { %1831 = dma.done.wait (%p2338_p7), [#allocation10], 784   ;;  %p2339_p6 = pmov %p2336_p3 }
  0x95   : > { %p2340_p9 = scmp.ne.s32.totalorder %s1947_s21, 0 }
  0x96   : > { %1833 = vsyncadd (%p2339_p6), [#allocation10], 4294966512  ;;  %v529_v0 = vld [vmem:[#allocation6] sm:$0x1] (!%p2340_p9)  ;;  %vm530_vm0 = vcmask (!%p2340_p9), 253952  }
  0x97   : > { %528 = sbr.rel (%p2340_p9) target bundleno = 158 (0x9e), region = 96  ;;  %531 = vst.msk [vmem:[#allocation2] sm:$0x1] (!%p2340_p9), %vm530_vm0, %v529_v0 }
  0x9e PF: > { %v1544_v1 = vld [vmem:[#allocation8 + $0x4] ss:$8 sps:$4 sm:$0xff]   ;;  %v1855_v3 = vmov 0   ;;  %v1548_v4 = vld [vmem:[#allocation8] ss:$8 sps:$4 sm:$0xff]   ;;  %vm561_vm1 = vcmask 261120  }
  0x9f   : > { %v1546_v2 = vld [vmem:[%s2308_s4 + $0x4] ss:$16 sps:$4 sm:$0xff]   ;;  %597 = vmatprep.mubr.bf16.mxu0 %v1855_v3  ;;  %689 = vmatprep.mubr.bf16.mxu1 %v1855_v3  ;;  %v1549_v5 = vld [vmem:[%s2308_s4] ss:$16 sps:$4 sm:$0xff]   ;;  %s1383_s28 = scalar_lea.vmem [#allocation3], %s1844_s18  ;;  %vm742_vm2 = vcmask 1040384  }
  0xa0   : > { %565 = vmatprep.subr.bf16.mxu0 %v1544_v1  ;;  %657 = vmatprep.subr.bf16.mxu1 %v1546_v2  ;;  %v1550_v6 = vld [vmem:[#allocation8 + $0x14] ss:$8 sps:$4 sm:$0xff]   ;;  %v1554_v8 = vld [vmem:[#allocation8 + $0x10] ss:$8 sps:$4 sm:$0xff]   ;;  %v740_v16 = vld [vmem:[#allocation9] sm:$0x1] }
  0xa1   : > { %566 = vmatpush1.bf16.msra.mxu0 %v1548_v4  ;;  %658 = vmatpush1.bf16.msra.mxu1 %v1549_v5  ;;  %v1552_v7 = vld [vmem:[%s2308_s4 + $0x24] ss:$16 sps:$4 sm:$0xff]   ;;  %v1555_v9 = vld [vmem:[%s2308_s4 + $0x20] ss:$16 sps:$4 sm:$0xff]   ;;  %v1385_v10 = vld [vmem:[%s1383_s28 - $0x1] sm:$0x1] }
  0xa2   : > { %567 = vmatprep.subr.bf16.mxu0 %v1550_v6  ;;  %v2122_v11 = vld [vmem:[#allocation2] sm:$0x1]  ;;  %659 = vmatprep.subr.bf16.mxu1 %v1552_v7  ;;  %v535_v12 = vpack.c.bf16 %v1385_v10, %v1385_v10  ;;  %v1856_v27 = vmov 0.0   ;;  %v1557_v28 = vld [vmem:[%s2306_s2 + $0x8] sm:$0xff]   ;;  %v1558_v29 = vld [vmem:[%s2306_s2 + $0x10] sm:$0xff]   ;;  %vm1857_vm3 = vmmov 0  }
  0xa3   : > { %v2126_v13 = vpack.c.bf16 %v2122_v11, %v2122_v11  ;;  %v1556_v26 = vld [vmem:[%s2306_s2] sm:$0xff]   ;;  %v1559_v30 = vld [vmem:[%s2306_s2 + $0x18] sm:$0xff]   ;;  %v1561_v37 = vld [vmem:[%s2306_s2 + $0x28] sm:$0xff]   ;;  %s1386_s15 = scalar_lea.vmem [#allocation15], %s1844_s18  ;;  %vm1108_vm4 = vcmask 253952   ;;  %s1389_s24 = scalar_lea.vmem [#allocation13], %s1844_s18 }
  0xa4   : > { %v1560_v36 = vld [vmem:[%s2306_s2 + $0x20] sm:$0xff]   ;;  %v1562_v38 = vld [vmem:[%s2306_s2 + $0x30] sm:$0xff]   ;;  %v1563_v39 = vld [vmem:[%s2306_s2 + $0x38] sm:$0xff]   ;;  %p1515_p10 = scmp.eq.s32.totalorder %s1947_s21, 7  ;;  %s1858_s22 = smov [#allocation13]  }
  0xa5   : > { %568 = vmatpush1.bf16.msra.mxu0 %v1554_v8  ;;  %660 = vmatpush1.bf16.msra.mxu1 %v1555_v9  ;;  %v1564_v40 = vld [vmem:[%s2308_s4 + $0x8] ss:$16 sps:$4 sm:$0xff]   ;;  %v1566_v41 = vld [vmem:[%s2308_s4 + $0xc] ss:$16 sps:$4 sm:$0xff]   ;;  %v1570_v44 = vld [vmem:[%s2310_s6] sm:$0xff]   ;;  %s1205_s27 = sshll.u32 %s1858_s22, 4  ;;  %s1206_s27 = int_to_ptr.vmem [resolvable:$true] %s1205_s27 }
  0xa6   : > { %1413 = vmatprep.subr.bf16.mxu1 %v1856_v27  ;;  %v1569_v42 = vld [vmem:[%s2308_s4 + $0x2c] ss:$16 sps:$4 sm:$0xff]   ;;  %698 = vmatprep.subr.bf16.mxu0 %v1566_v41  ;;  %v1567_v43 = vld [vmem:[%s2308_s4 + $0x28] ss:$16 sps:$4 sm:$0xff]   ;;  %v922_v0 = vld [vmem:[%s2311_s7] sm:$0x1]  ;;  %p1747_p13 = scmp.lt.s32.totalorder %s1206_s27, %s1206_s27 }
  0xa7   : > { %v1571_v45 = vld [vmem:[%s2310_s6 + $0x8] sm:$0xff]   ;;  %v1574_v59 = vld [vmem:[#allocation11 + $0x4] ss:$12 sps:$4 sm:$0xff]   ;;  %v1578_v7 = vld [vmem:[#allocation11 + $0x8] ss:$12 sps:$4 sm:$0xff]   ;;  %s1740_s25 = scalar_lea.vmem %s1206_s27, 128 }
  0xa8   : > { %1337 = vmatmul.mubr.msk.bf16.vlgmr.msra.gmra.mrb[0].mxu0 %vm561_vm1, %v535_v12  ;;  %1346 = vmatmul.mubr.msk.bf16.vlgmr.msra.gmra.mrb[0].mxu1 %vm561_vm1, %v2126_v13  ;;  %v1572_v60 = vld [vmem:[#allocation11] ss:$12 sps:$4 sm:$0xff]   ;;  %v1577_v61 = vld [vmem:[#allocation11 + $0x1c] ss:$12 sps:$4 sm:$0xff]   ;;  %v1575_v62 = vld [vmem:[#allocation11 + $0x18] ss:$12 sps:$4 sm:$0xff]   ;;  %p1741_p11 = scmp.ne.s32.totalorder %s1206_s27, %s1740_s25  ;;  %p1748_p0 = scmp.lt.s32.totalorder %s1740_s25, %s1740_s25 }
  0xa9   : > { %730 = vmatprep.mubr.bf16.mxu0 %v1855_v3  ;;  %1414 = vmatpush3.bf16.msra.mxu1 %v1556_v26  ;;  %v1579_v9 = vld [vmem:[#allocation11 + $0x20] ss:$12 sps:$4 sm:$0xff]   ;;  %v1580_v10 = vld [vmem:[%s2315_s11] sm:$0xff]  }
  0xaa   : > { %1415 = vmatprep.subr.bf16.mxu1 %v1856_v27  ;;  %1429 = vmatprep.mubr.msk.bf16.mxu1 %vm1857_vm3, %v1856_v27  ;;  %v1581_v12 = vld [vmem:[%s2315_s11 + $0x8] sm:$0xff]   ;;  %p1742_p12 = pnand %p1741_p11, %p1515_p10  ;;  %p1749_p1 = por %p1748_p0, %p1747_p13 }
  0xab   : > { %699 = vmatpush1.bf16.msra.mxu0 %v1564_v40 }
  0xac   : > { %700 = vmatprep.subr.bf16.mxu0 %v1569_v42  ;;  %p1743_p2 = pneg %p1742_p12 }
  0xad   : > { %1416 = vmatpush3.bf16.msra.mxu1 %v1557_v28 }
  0xae   : > { %1417 = vmatprep.subr.bf16.mxu1 %v1856_v27  ;;  %p1750_p5 = pnand %p1749_p1, %p1743_p2 }
  0xaf   : > { %701 = vmatpush1.bf16.msra.mxu0 %v1567_v43 }
  0xb0   : > { %1433 = vmatprep.subr.bf16.mxu0 %v1856_v27 }
  0xb1   : > { %1418 = vmatpush3.bf16.msra.mxu1 %v1558_v29 }
  0xb2   : > { %1419 = vmatprep.subr.bf16.mxu1 %v1856_v27  ;;  %1347 = vmatmul.mubr.msk.bf16.vlgmr.msra.gmra.mrb[4].mxu0 %vm561_vm1, %v2126_v13  ;;  %v968_v13 = vlaneseq }
  0xb3   : > { %1434 = vmatpush3.bf16.msra.mxu0 %v1570_v44  ;;  %1437 = vmatprep.mubr.msk.bf16.mxu0 %vm1857_vm3, %v1856_v27 }
  0xb4   : > { %1435 = vmatprep.subr.bf16.mxu0 %v1856_v27 }
  0xb5   : > { %1420 = vmatpush3.bf16.msra.mxu1 %v1559_v30 }
  0xb6   : > { %1421 = vmatprep.subr.bf16.mxu1 %v1856_v27 }
  0xb7   : > { %1436 = vmatpush3.bf16.msra.mxu0 %v1571_v45 }
  0xb8   : > { %986 = vmatprep.subr.bf16.mxu0 %v1574_v59 }
  0xb9   : > { %1422 = vmatpush3.bf16.msra.mxu1 %v1560_v36 }
  0xba   : > { %1423 = vmatprep.subr.bf16.mxu1 %v1856_v27 }
  0xbd   : > { %1424 = vmatpush3.bf16.msra.mxu1 %v1561_v37 }
  0xbe   : > { %1425 = vmatprep.subr.bf16.mxu1 %v1856_v27 }
  0xc1   : > { %1426 = vmatpush3.bf16.msra.mxu1 %v1562_v38 }
  0xc2   : > { %1427 = vmatprep.subr.bf16.mxu1 %v1856_v27 }
  0xc5   : > { %1428 = vmatpush3.bf16.msra.mxu1 %v1563_v39 }
 0x17b   : > { %v599_v14 = vpop.f32.mrb[0].mxu0  ;;  %v691_v15 = vpop.f32.mrb[0].mxu1 }
 0x17c   : > { %v739_v17 = vadd.f32 %v691_v15, %v599_v14  ;;  %v2132_v18 = vpop.f32.mrb[1].mxu0  ;;  %v2134_v19 = vpop.f32.mrb[1].mxu1  ;;  %v969_v14 = vshrl.u32 %v968_v13, 7 }
 0x17d   : > { %v603_v20 = vpop.f32.mrb[2].mxu0  ;;  %v695_v21 = vpop.f32.mrb[2].mxu1 }
 0x17e   : > { %v604_v22 = vpop.f32.mrb[3].mxu0  ;;  %v696_v23 = vpop.f32.mrb[3].mxu1  ;;  %v741_v24 = vadd.f32 %v740_v16, %v739_v17  ;;  %v970_v15 = vsub.s32 0, %v969_v14  ;;  %v1067_v16 = vld [vmem:[%s2314_s10] sm:$0x7]  ;;  %v974_v17 = vsub.s32 1, %v969_v14 }
 0x180   : > { %v743_v25 = vsel %vm742_vm2, %v741_v24, -inf  ;;  %v1072_v20 = vrot.slane %v1067_v16, %v970_v15  ;;  %v1076_v22 = vrot.slane %v1067_v16, %v974_v17 }
 0x181   : > { %744 = vmax.xlane.f32.xlu0 %v743_v25 }
 0x182   : > { %v1084_v25 = vadd.f32 %v1072_v20, %v2134_v19  ;;  %v978_v19 = vsub.s32 2, %v969_v14 }
 0x184   : > { %v1080_v43 = vrot.slane %v1067_v16, %v978_v19 }
 0x185   : > { %v732_v50 = vpop.f32.mrb[4].mxu0 }
 0x186   : > { %v2197_v51 = vpop.f32.mrb[5].mxu0  ;;  %v1085_v28 = vadd.f32 %v1076_v22, %v732_v50 }
 0x187   : > { %v736_v52 = vpop.f32.mrb[6].mxu0 }
 0x188   : > { %v737_v53 = vpop.f32.mrb[7].mxu0 }
 0x20e   : > { %v745_v31 = vpop.xlane.xlu0 %744 }
 0x20f   : > { %v746_v32 = vsub.f32 %v741_v24, %v745_v31 }
 0x211   : > { %v747_v33 = vmul.f32 1.442695, %v746_v32 }
 0x213   : > { %1582 = vpow2.f32 %v747_v33 }
 0x21d   : > { %v1583_v34 = vpop.eup %1582 }
 0x21e   : > { %v749_v35 = vsel %vm742_vm2, %v1583_v34, 0.0 }
 0x21f   : > { %750 = vadd.xlane.f32.xlu0 %v749_v35 }
 0x2ac   : > { %v751_v46 = vpop.xlane.xlu0 %750 }
 0x2ad   : > { %1584 = vrcp.f32 %v751_v46  ;;  %v1086_v46 = vadd.f32 %v1080_v43, %v2197_v51  ;;  %v1117_v51 = vld [vmem:[%s2316_s12] sm:$0x1] }
 0x2b7   : > { %v1585_v47 = vpop.eup %1584 }
 0x2b8   : > { %v753_v48 = vmul.f32 %v1585_v47, %v1583_v34 }
 0x2ba   : > { %v756_v49 = vpack.c.bf16 %v753_v48, %v753_v48  ;;  %1388 = vst [vmem:[%s1386_s15 - $0x1] sm:$0x1] %v753_v48 }
 0x2bc   : > { %1430 = vmatmul.mubr.bf16.vlgmr.msra.gmra.mrb[4].mxu1 %v756_v49 }
 0x38f   : > { %v855_v54 = vpop.f32.mrb[4].mxu1 }
 0x390   : > { %v861_v55 = vpack.c.bf16 %v855_v54, %v855_v54  ;;  %v1431_v56 = vpop.f32.mrb[5].mxu1 }
 0x391   : > { %v858_v57 = vpop.f32.mrb[6].mxu1 }
 0x392   : > { %v1432_v58 = vpop.f32.mrb[7].mxu1  ;;  %1438 = vmatmul.mubr.msk.bf16.vlgmr.msra.gmra.mrb[8].mxu0 %vm561_vm1, %v861_v55 }
 0x393   : > { %1018 = vmatprep.mubr.bf16.mxu0 %v1855_v3  ;;  %987 = vmatpush1.bf16.msra.mxu0 %v1572_v60 }
 0x394   : > { %988 = vmatprep.subr.bf16.mxu0 %v1577_v61 }
 0x397   : > { %989 = vmatpush1.bf16.msra.mxu0 %v1575_v62 }
 0x398   : > { %1441 = vmatprep.subr.bf16.mxu0 %v1856_v27 }
 0x465   : > { %v915_v63 = vpop.f32.mrb[8].mxu0 }
 0x466   : > { %v921_v1 = vadd.f32 %v915_v63, %v2132_v18  ;;  %v1439_v2 = vpop.f32.mrb[9].mxu0  ;;  %v934_v18 = vld [vmem:[%s2313_s9] sm:$0x7] }
 0x467   : > { %v918_v4 = vpop.f32.mrb[10].mxu0  ;;  %v971_v21 = vrot.slane %v934_v18, %v970_v15  ;;  %v975_v23 = vrot.slane %v934_v18, %v974_v17  ;;  %v979_v45 = vrot.slane %v934_v18, %v978_v19 }
 0x468   : > { %v923_v3 = vadd.f32 %v922_v0, %v921_v1  ;;  %v1440_v5 = vpop.f32.mrb[11].mxu0 }
 0x46a   : > { %v924_v6 = vmax.f32 %v923_v3, 0.0 }
 0x46c   : > { %v925_v8 = vpack.c.bf16 %v924_v6, %v924_v6 }
 0x46e   : > { %1366 = vmatmul.mubr.msk.bf16.vlgmr.msra.gmra.mrb[12].mxu0 %vm561_vm1, %v925_v8 }
 0x46f   : > { %1442 = vmatpush3.bf16.msra.mxu0 %v1578_v7  ;;  %1445 = vmatprep.mubr.msk.bf16.mxu0 %vm1857_vm3, %v1856_v27 }
 0x470   : > { %1443 = vmatprep.subr.bf16.mxu0 %v1856_v27 }
 0x473   : > { %1444 = vmatpush3.bf16.msra.mxu0 %v1579_v9 }
 0x474   : > { %1449 = vmatprep.subr.bf16.mxu0 %v1856_v27 }
 0x476   : > { %1446 = vmatmul.mubr.msk.bf16.vlgmr.msra.gmra.mrb[16].mxu0 %vm561_vm1, %v925_v8 }
 0x477   : > { %1453 = vmatprep.mubr.msk.bf16.mxu0 %vm1857_vm3, %v1856_v27  ;;  %1450 = vmatpush3.bf16.msra.mxu0 %v1580_v10 }
 0x478   : > { %1451 = vmatprep.subr.bf16.mxu0 %v1856_v27 }
 0x47b   : > { %1452 = vmatpush3.bf16.msra.mxu0 %v1581_v12 }
 0x541   : > { %v1020_v24 = vpop.f32.mrb[12].mxu0 }
 0x542   : > { %v1021_v26 = vadd.f32 %v1020_v24, %v971_v21  ;;  %v1022_v27 = vpop.f32.mrb[13].mxu0 }
 0x543   : > { %v1023_v29 = vadd.f32 %v1022_v27, %v975_v23  ;;  %v1024_v30 = vpop.f32.mrb[14].mxu0 }
 0x544   : > { %v1087_v31 = vadd.f32 %v1084_v25, %v1021_v26  ;;  %v1025_v32 = vpop.f32.mrb[15].mxu0 }
 0x545   : > { %v1094_v33 = vadd.f32 %v1085_v28, %v1023_v29 }
 0x546   : > { %v1368_v34 = vmul.f32 -1.442695, %v1087_v31 }
 0x547   : > { %v1369_v37 = vmul.f32 -1.442695, %v1094_v33 }
 0x548   : > { %1586 = vpow2.f32 %v1368_v34 }
 0x549   : > { %v1061_v35 = vpop.f32.mrb[16].mxu0  ;;  %1588 = vpow2.f32 %v1369_v37 }
 0x54a   : > { %v1447_v36 = vpop.f32.mrb[17].mxu0  ;;  %v1062_v48 = vadd.f32 %v1061_v35, %v979_v45 }
 0x54b   : > { %v1064_v38 = vpop.f32.mrb[18].mxu0 }
 0x54c   : > { %v1448_v39 = vpop.f32.mrb[19].mxu0 }
 0x552   : > { %v1587_v40 = vpop.eup %1586 }
 0x553   : > { %v1091_v41 = vadd.f32 1.0, %v1587_v40  ;;  %v1589_v42 = vpop.eup %1588 }
 0x554   : > { %v1098_v44 = vadd.f32 1.0, %v1589_v42 }
 0x555   : > { %1590 = vrcp.f32 %v1091_v41 }
 0x556   : > { %1592 = vrcp.f32 %v1098_v44 }
 0x55f   : > { %v1591_v47 = vpop.eup %1590 }
 0x560   : > { %v1101_v49 = vmul.f32 %v1591_v47, %v1086_v46  ;;  %v1593_v52 = vpop.eup %1592 }
 0x561   : > { %v1104_v53 = vsub.f32 1.0, %v1593_v52  ;;  %v1106_v55 = vmul.f32 %v1593_v52, %v2122_v11 }
 0x562   : > { %v1102_v50 = vadd.f32 %v1101_v49, %v1062_v48 }
 0x564   : > { %1594 = vtanh.f32 %v1102_v50 }
 0x56e   : > { %v1595_v54 = vpop.eup %1594 }
 0x56f   : > { %v1105_v56 = vmul.f32 %v1595_v54, %v1104_v53 }
 0x571   : > { %v1107_v57 = vadd.f32 %v1106_v55, %v1105_v56 }
 0x573   : > { %v1112_v58 = vpack.c.bf16 %v1107_v57, %v1107_v57  ;;  %1109 = vst.msk [vmem:[#allocation2] sm:$0x1] %vm1108_vm4, %v1107_v57  ;;  %1391 = vst.msk [vmem:[%s1389_s24 - $0x1] sm:$0x1] %vm1108_vm4, %v1107_v57 }
 0x575   : > { %1454 = vmatmul.mubr.msk.bf16.vlgmr.msra.gmra.mrb[20].mxu0 %vm561_vm1, %v1112_v58 }
 0x648   : > { %v1167_v59 = vpop.f32.mrb[20].mxu0 }
 0x649   : > { %v1168_v60 = vadd.f32 %v1167_v59, %v1117_v51  ;;  %v1455_v61 = vpop.f32.mrb[21].mxu0 }
 0x64a   : > { %v1170_v62 = vpop.f32.mrb[22].mxu0 }
 0x64b   : > { %v1456_v63 = vpop.f32.mrb[23].mxu0  ;;  %v1173_v11 = vsel %vm742_vm2, %v1168_v60, -inf }
 0x64c   : > { %1174 = vmax.xlane.f32.xlu1 %v1173_v11 }
 0x6d9   : > { %v1175_v0 = vpop.xlane.xlu1 %1174 }
 0x6da   : > { %v1176_v1 = vsub.f32 %v1168_v60, %v1175_v0 }
 0x6dc   : > { %v1177_v2 = vmul.f32 1.442695, %v1176_v1 }
 0x6de   : > { %1596 = vpow2.f32 %v1177_v2 }
 0x6e8   : > { %v1597_v4 = vpop.eup %1596 }
 0x6e9   : > { %v1179_v3 = vsel %vm742_vm2, %v1597_v4, 0.0 }
 0x6ea   : > { %1180 = vadd.xlane.f32.xlu1 %v1179_v3 }
 0x6eb   : > { %1753 = shalt.err (!%p1750_p5)
}
 0x6ec   : > { %s2341_s17 = sld [smem:[#allocation23_spill]] }
 0x6f2   : > { %s1754_s19 = scalar_lea.hbm %s2341_s17, 128 }
 0x6f3   : > { %p1755_p8 = scmp.ne.s32.totalorder %s2341_s17, %s1754_s19  ;;  %p1760_p7 = scmp.lt.u32.totalorder %s1754_s19, %s2341_s17 }
 0x6f5   : > { %p1756_p3 = pnand %p1755_p8, %p1515_p10 }
 0x6f7   : > { %p1757_p4 = pneg %p1756_p3 }
 0x6f9   : > { %p1762_p6 = pnand %p1760_p7, %p1757_p4 }
 0x6fb   : > { %1765 = shalt.err (!%p1762_p6)
}
 0x6fc   : > { %1480 = dma.vmem_to_hbm [thread:$0]  (%p1515_p10), %s1206_s27, 128, %s2341_s17, [#allocation14]  }
 0x6fd   : > { %s1859_s20 = smov [#allocation15]  }
 0x6fe   : > { %s1216_s24 = sshll.u32 %s1859_s20, 4  ;;  %s1217_s24 = int_to_ptr.vmem [resolvable:$true] %s1216_s24 }
 0x6ff   : > { %s1766_s14 = scalar_lea.vmem %s1217_s24, 128  ;;  %p1773_p2 = scmp.lt.s32.totalorder %s1217_s24, %s1217_s24 }
 0x700   : > { %p1767_p9 = scmp.ne.s32.totalorder %s1217_s24, %s1766_s14  ;;  %p1774_p13 = scmp.lt.s32.totalorder %s1766_s14, %s1766_s14 }
 0x702   : > { %p1768_p11 = pnand %p1767_p9, %p1515_p10  ;;  %p1775_p0 = por %p1774_p13, %p1773_p2 }
 0x704   : > { %p1769_p12 = pneg %p1768_p11 }
 0x706   : > { %p1776_p1 = pnand %p1775_p0, %p1769_p12 }
 0x708   : > { %1779 = shalt.err (!%p1776_p1)
}
 0x709   : > { %s2342_s25 = sld [smem:[#allocation24_spill]] }
 0x70f   : > { %s1780_s15 = scalar_lea.hbm %s2342_s25, 128 }
 0x710   : > { %p1781_p5 = scmp.ne.s32.totalorder %s2342_s25, %s1780_s15  ;;  %p1786_p4 = scmp.lt.u32.totalorder %s1780_s15, %s2342_s25 }
 0x712   : > { %p1782_p8 = pnand %p1781_p5, %p1515_p10 }
 0x714   : > { %p1783_p3 = pneg %p1782_p8 }
 0x716   : > { %p1788_p7 = pnand %p1786_p4, %p1783_p3 }
 0x718   : > { %1791 = shalt.err (!%p1788_p7)
}
 0x719   : > { %1482 = dma.vmem_to_hbm [thread:$0]  (%p1515_p10), %s1217_s24, 128, %s2342_s25, [#allocation14]  }
 0x71a   : > { %s1860_s16 = smov [#allocation12]   ;;  %s1392_s29 = scalar_lea.vmem [#allocation12], %s1844_s18 }
 0x71b   : > { %s1194_s26 = sshll.u32 %s1860_s16, 4  ;;  %s1195_s26 = int_to_ptr.vmem [resolvable:$true] %s1194_s26 }
 0x71c   : > { %s1792_s20 = scalar_lea.vmem %s1195_s26, 128  ;;  %p1799_p12 = scmp.lt.s32.totalorder %s1195_s26, %s1195_s26 }
 0x71d   : > { %p1793_p6 = scmp.ne.s32.totalorder %s1195_s26, %s1792_s20  ;;  %p1800_p2 = scmp.lt.s32.totalorder %s1792_s20, %s1792_s20 }
 0x71f   : > { %p1794_p9 = pnand %p1793_p6, %p1515_p10  ;;  %p1801_p13 = por %p1800_p2, %p1799_p12 }
 0x721   : > { %p1795_p11 = pneg %p1794_p9 }
 0x723   : > { %p1802_p0 = pnand %p1801_p13, %p1795_p11 }
 0x777   : > { %v1181_v5 = vpop.xlane.xlu1 %1180 }
 0x778   : > { %1598 = vlog2.f32 %v1181_v5 }
 0x782   : > { %v1599_v6 = vpop.eup %1598 }
 0x783   : > { %v1183_v7 = vmul.f32 0.6931472, %v1599_v6 }
 0x785   : > { %v1184_v8 = vsub.f32 %v1176_v1, %v1183_v7 }
 0x787   : > { %1394 = vst [vmem:[%s1392_s29 - $0x1] sm:$0x1] %v1184_v8 }
 0x788   : > { %1805 = shalt.err (!%p1802_p0)
}
 0x789   : > { %s2343_s0 = sld [smem:[#allocation22_spill]] }
 0x78f   : > { %s1806_s22 = scalar_lea.hbm %s2343_s0, 128 }
 0x790   : > { %p1807_p1 = scmp.ne.s32.totalorder %s2343_s0, %s1806_s22  ;;  %p1812_p3 = scmp.lt.u32.totalorder %s1806_s22, %s2343_s0 }
 0x792   : > { %p1808_p5 = pnand %p1807_p1, %p1515_p10 }
 0x794   : > { %p1809_p8 = pneg %p1808_p5 }
 0x796   : > { %p1814_p4 = pnand %p1812_p3, %p1809_p8 }
 0x798   : > { %1817 = shalt.err (!%p1814_p4)
}
 0x799   : > { %1478 = dma.vmem_to_hbm [thread:$0]  (%p1515_p10), %s1195_s26, 128, %s2343_s0, [#allocation5]  }
 0x79a   : > { %1835 = dma.done.wait (%p1515_p10), [#allocation5], 128  }
 0x79b   : > { %1837 = vsyncadd (%p1515_p10), [#allocation5], 4294967168 }
 0x79c   : > { %1839 = dma.done.wait (%p1515_p10), [#allocation14], 256  }
 0x79d   : > { %1841 = vsyncadd (%p1515_p10), [#allocation14], 4294967040 }
 0x79e PF: > { %s31_s18 = sadd.s32 1, %s1844_s18  }
 0x79f   : > { %p28_p7 = scmp.ge.s32.totalorder %s31_s18, 10  }
 0x7a1   :  { %30 = sbr.rel (!%p28_p7) target bundleno = 10 (0xa), region = 141 }
 0x7a8   :  { %1237 = vsyncpa [#allocation4], 1 }
 0x7a9   :  { %1239 = vsyncpa [#allocation4 + $0x1], 1 }
 0x7aa   :  { %1240 = vsyncpa [#allocation7], 1 }
 0x7ab   :  { %1241 = vsyncpa [#allocation10], 1 }
 0x7ac   :  { %1242 = vsyncpa [#allocation5], 1 }
 0x7ad   :  { %1244 = vsyncpa [#allocation5 + $0x1], 1 }
 0x7ae   :  { %1245 = vsyncpa [#allocation14], 1 }

</bundles_post_ra>
